<compile_context>
chip_gen: v7x
topology: tpu7x:2x2x1
jax: 0.10.0
libtpu: 0.0.40
codegen_flags: <defaults>
</compile_context>

<pallas_src>
import jax
import jax.numpy as jnp
from jax.experimental import pallas as pl
from jax.experimental.pallas import tpu as pltpu


def mlp_kernel(x_ref, w1_ref, b1_ref, w2_ref, b2_ref, o_ref, acc_ref):
    k = pl.program_id(1)

    @pl.when(k == 0)
    def _():
        acc_ref[...] = jnp.zeros_like(acc_ref)

    # First matmul on this ffn block: (TB, H) @ (H, tF) -> f32 (TB, tF)
    x = x_ref[...].astype(jnp.bfloat16)
    h = jnp.dot(x, w1_ref[...], preferred_element_type=jnp.float32)
    h = h + b1_ref[...]                      # f32 bias slice for this F block
    h = jnp.maximum(h, 0.0)                  # ReLU

    # Second matmul, accumulated over ffn blocks: (TB, tF) @ (tF, H) -> (TB, H)
    acc_ref[...] += jnp.dot(h.astype(jnp.bfloat16), w2_ref[...],
                            preferred_element_type=jnp.float32)

    @pl.when(k == pl.num_programs(1) - 1)
    def _():
        o_ref[...] = (acc_ref[...] + b2_ref[...]).astype(o_ref.dtype)


def _round_up(x, m):
    return ((x + m - 1) // m) * m


def _default_batch_tile():
    try:
        kind = jax.devices()[0].device_kind.lower()
    except Exception:
        return 256
    return 128 if "v5" in kind else 256      # v5e MXU is 128-row; v6e/v7x 256


def _pick_ffn_tile(F):
    # Prefer 256-multiples (v6e/v7x MXU is 2x256x256); 128 is fine on v5e.
    for t in (1024, 512, 256):
        if F % t == 0:
            return t
    if F % 128 == 0:
        return 128
    return F                                  # small / unaligned: whole axis


def simple_mlp_forward(x, w1, b1, w2, b2, *, batch_tile=None, ffn_tile=None):
    B, H = x.shape
    F = w1.shape[1]
    b1 = jnp.reshape(b1, (1, F))
    b2 = jnp.reshape(b2, (1, H))

    # --- tile selection -----------------------------------------------------
    if batch_tile is None:
        batch_tile = _default_batch_tile()
    batch_tile = max(8, min(batch_tile, _round_up(B, 8)))
    # keep >= 2 batch grid steps when possible so v7x's two TCs both get work
    while batch_tile > 8 and pl.cdiv(B, batch_tile) < 2:
        batch_tile //= 2
    batch_tile = _round_up(batch_tile, 8)

    if ffn_tile is None:
        ffn_tile = _pick_ffn_tile(F)
    tF = ffn_tile
    assert F % tF == 0

    # --- ragged batch: pad instead of asserting divisibility ----------------
    nb = pl.cdiv(B, batch_tile)
    B_pad = nb * batch_tile
    x_in = x if B_pad == B else jnp.pad(x, ((0, B_pad - B), (0, 0)))

    # --- bf16 weights on the wire / in VMEM, f32 biases ----------------------
    w1_bf = w1.astype(jnp.bfloat16)
    w2_bf = w2.astype(jnp.bfloat16)
    b1_f32 = b1.astype(jnp.float32)
    b2_f32 = b2.astype(jnp.float32)

    grid = (nb, F // tF)

    # --- explicit VMEM budget (double-buffered tiles + accumulator) ----------
    vmem_bytes = (
        2 * batch_tile * H * x.dtype.itemsize      # x tiles (double-buffered)
        + 2 * batch_tile * H * x.dtype.itemsize    # out tiles
        + batch_tile * H * 4                       # f32 accumulator
        + 2 * (H * tF + tF * H) * 2                # bf16 w1/w2 tiles (2 bufs)
        + 4 * (tF + H) * 4                         # biases
    )
    vmem_limit = int(min(64 << 20, max(32 << 20, 2 * vmem_bytes)))

    out = pl.pallas_call(
        mlp_kernel,
        out_shape=jax.ShapeDtypeStruct((B_pad, H), x.dtype),
        grid_spec=pltpu.PrefetchScalarGridSpec(
            num_scalar_prefetch=0,
            grid=grid,
            in_specs=[
                pl.BlockSpec((batch_tile, H), lambda i, k: (i, 0)),  # x tile
                pl.BlockSpec((H, tF), lambda i, k: (0, k)),          # w1 block
                pl.BlockSpec((1, tF), lambda i, k: (0, k)),          # b1 block
                pl.BlockSpec((tF, H), lambda i, k: (k, 0)),          # w2 block
                pl.BlockSpec((1, H), lambda i, k: (0, 0)),           # b2
            ],
            out_specs=pl.BlockSpec((batch_tile, H), lambda i, k: (i, 0)),
            scratch_shapes=[pltpu.VMEM((batch_tile, H), jnp.float32)],
        ),
        compiler_params=pltpu.CompilerParams(
            dimension_semantics=("parallel", "arbitrary"),
            vmem_limit_bytes=vmem_limit,
        ),
    )(x_in, w1_bf, b1_f32, w2_bf, b2_f32)

    return out if B_pad == B else out[:B]


def init_params(key, hidden_size, ffn_hidden_size, dtype=jnp.float32):
    # Deterministic init mimicking torch.nn.Linear defaults:
    # U(-1/sqrt(fan_in), 1/sqrt(fan_in)) for both weight and bias.
    k1, k2, k3, k4 = jax.random.split(key, 4)
    bound1 = 1.0 / (hidden_size ** 0.5)
    bound2 = 1.0 / (ffn_hidden_size ** 0.5)
    w1 = jax.random.uniform(k1, (hidden_size, ffn_hidden_size),
                            minval=-bound1, maxval=bound1, dtype=dtype)
    b1 = jax.random.uniform(k2, (1, ffn_hidden_size),
                            minval=-bound1, maxval=bound1, dtype=dtype)
    w2 = jax.random.uniform(k3, (ffn_hidden_size, hidden_size),
                            minval=-bound2, maxval=bound2, dtype=dtype)
    b2 = jax.random.uniform(k4, (1, hidden_size),
                            minval=-bound2, maxval=bound2, dtype=dtype)
    return w1, b1, w2, b2


if __name__ == "__main__":
    # Small but MXU-friendly shapes: batch=512, hidden=256, ffn=4*hidden=1024.
    hidden_size = 256
    ffn_hidden_size = hidden_size * 4
    batch = 512

    key = jax.random.PRNGKey(0)
    kx, kp = jax.random.split(key)
    x = jax.random.normal(kx, (batch, hidden_size), dtype=jnp.float32)
    w1, b1, w2, b2 = init_params(kp, hidden_size, ffn_hidden_size)

    # batch_tile=128 -> 4 batch grid steps (exercises both TCs on v7x),
    # ffn tile 512 -> 2 accumulation steps (exercises the streaming path).
    out = simple_mlp_forward(x, w1, b1, w2, b2, batch_tile=128, ffn_tile=512)
    out = jax.block_until_ready(out)
    assert out.shape == (batch, hidden_size)

    # Reference with the same bf16-input / f32-accumulate recipe as the kernel.
    xb = x.astype(jnp.bfloat16)
    w1b = w1.astype(jnp.bfloat16)
    w2b = w2.astype(jnp.bfloat16)
    h_ref = jnp.maximum(
        jnp.dot(xb, w1b, preferred_element_type=jnp.float32) + b1, 0.0)
    ref = jnp.dot(h_ref.astype(jnp.bfloat16), w2b,
                  preferred_element_type=jnp.float32) + b2
    assert jnp.allclose(out, ref, atol=1e-3, rtol=1e-3)

    # Loose sanity check against the pure-f32 reference (bf16 rounding only).
    ref_f32 = jnp.maximum(x @ w1 + b1, 0.0) @ w2 + b2
    assert jnp.allclose(out, ref_f32, atol=1e-1, rtol=1e-1)

    print("KERNEL_OK")
</pallas_src>

<mosaic_0001>
module attributes {stable_mosaic.version = 11 : i64} {
  func.func @mlp_kernel(%arg0: i32, %arg1: i32, %arg2: memref<128x256xf32, #tpu.memory_space<vmem>>, %arg3: memref<256x512xbf16, #tpu.memory_space<vmem>>, %arg4: memref<1x512xf32, #tpu.memory_space<vmem>>, %arg5: memref<512x256xbf16, #tpu.memory_space<vmem>>, %arg6: memref<1x256xf32, #tpu.memory_space<vmem>>, %arg7: memref<128x256xf32, #tpu.memory_space<vmem>>, %arg8: memref<128x256xf32, #tpu.memory_space<vmem>>) attributes {dimension_semantics = [#tpu.dimension_semantics<parallel>, #tpu.dimension_semantics<arbitrary>], iteration_bounds = array<i64: 4, 2>, scalar_prefetch = 0 : i64, scratch_operands = 1 : i64, tpu.core_type = #tpu.core_type<tc>, window_params = [{transform_indices = @transform_0, window_bounds = array<i64: 128, 256>}, {transform_indices = @transform_1, window_bounds = array<i64: 256, 512>}, {transform_indices = @transform_2, window_bounds = array<i64: 1, 512>}, {transform_indices = @transform_3, window_bounds = array<i64: 512, 256>}, {pipeline_mode = #tpu.pipeline_mode<synchronous>, transform_indices = @transform_4, window_bounds = array<i64: 1, 256>}, {transform_indices = @transform_5, window_bounds = array<i64: 128, 256>}]} {
    %c0_i32 = arith.constant 0 : i32
    %0 = arith.cmpi eq, %arg1, %c0_i32 : i32
    %1 = arith.extui %0 : i1 to i32
    %c0_i32_0 = arith.constant 0 : i32
    %2 = arith.cmpi ne, %1, %c0_i32_0 : i32
    scf.if %2 {
      %cst_15 = arith.constant 0.000000e+00 : f32
      %21 = vector.broadcast %cst_15 : f32 to vector<128x256xf32>
      %c0_16 = arith.constant 0 : index
      %c0_17 = arith.constant 0 : index
      %22 = vector.load %arg8[%c0_16, %c0_17] : memref<128x256xf32, #tpu.memory_space<vmem>>, vector<128x256xf32>
      tpu.vector_store %arg8[%c0_16, %c0_17], %21 {strides = array<i32>} : memref<128x256xf32, #tpu.memory_space<vmem>>, vector<128x256xf32>,
    } else {
    }
    %c0 = arith.constant 0 : index
    %c0_1 = arith.constant 0 : index
    %3 = vector.load %arg2[%c0, %c0_1] : memref<128x256xf32, #tpu.memory_space<vmem>>, vector<128x256xf32>
    %4 = arith.truncf %3 : vector<128x256xf32> to vector<128x256xbf16>
    %c0_2 = arith.constant 0 : index
    %c0_3 = arith.constant 0 : index
    %5 = vector.load %arg3[%c0_2, %c0_3] : memref<256x512xbf16, #tpu.memory_space<vmem>>, vector<256x512xbf16>
    %cst = arith.constant dense<0.000000e+00> : vector<128x512xf32>
    %6 = tpu.matmul %4, %5, %cst {dimension_numbers = #tpu.dot_dimension_numbers<[1], [0], [0], [1], [0, 0, 1, 1], [], []>} : vector<128x256xbf16>, vector<256x512xbf16>, vector<128x512xf32> -> vector<128x512xf32>
    %c0_4 = arith.constant 0 : index
    %c0_5 = arith.constant 0 : index
    %7 = vector.load %arg4[%c0_4, %c0_5] : memref<1x512xf32, #tpu.memory_space<vmem>>, vector<1x512xf32>
    %8 = vector.broadcast %7 : vector<1x512xf32> to vector<128x512xf32>
    %9 = arith.addf %6, %8 : vector<128x512xf32>
    %cst_6 = arith.constant 0.000000e+00 : f32
    %10 = vector.broadcast %cst_6 : f32 to vector<128x512xf32>
    %11 = arith.maximumf %9, %10 : vector<128x512xf32>
    %c0_7 = arith.constant 0 : index
    %c0_8 = arith.constant 0 : index
    %12 = vector.load %arg8[%c0_7, %c0_8] : memref<128x256xf32, #tpu.memory_space<vmem>>, vector<128x256xf32>
    %13 = arith.truncf %11 : vector<128x512xf32> to vector<128x512xbf16>
    %c0_9 = arith.constant 0 : index
    %c0_10 = arith.constant 0 : index
    %14 = vector.load %arg5[%c0_9, %c0_10] : memref<512x256xbf16, #tpu.memory_space<vmem>>, vector<512x256xbf16>
    %cst_11 = arith.constant dense<0.000000e+00> : vector<128x256xf32>
    %15 = tpu.matmul %13, %14, %cst_11 {dimension_numbers = #tpu.dot_dimension_numbers<[1], [0], [0], [1], [0, 0, 1, 1], [], []>} : vector<128x512xbf16>, vector<512x256xbf16>, vector<128x256xf32> -> vector<128x256xf32>
    %16 = arith.addf %12, %15 : vector<128x256xf32>
    %c0_12 = arith.constant 0 : index
    %c0_13 = arith.constant 0 : index
    %17 = vector.load %arg8[%c0_12, %c0_13] : memref<128x256xf32, #tpu.memory_space<vmem>>, vector<128x256xf32>
    tpu.vector_store %arg8[%c0_12, %c0_13], %16 {strides = array<i32>} : memref<128x256xf32, #tpu.memory_space<vmem>>, vector<128x256xf32>,
    %c1_i32 = arith.constant 1 : i32
    %18 = arith.cmpi eq, %arg1, %c1_i32 : i32
    %19 = arith.extui %18 : i1 to i32
    %c0_i32_14 = arith.constant 0 : i32
    %20 = arith.cmpi ne, %19, %c0_i32_14 : i32
    scf.if %20 {
      %c0_15 = arith.constant 0 : index
      %c0_16 = arith.constant 0 : index
      %21 = vector.load %arg8[%c0_15, %c0_16] : memref<128x256xf32, #tpu.memory_space<vmem>>, vector<128x256xf32>
      %c0_17 = arith.constant 0 : index
      %c0_18 = arith.constant 0 : index
      %22 = vector.load %arg6[%c0_17, %c0_18] : memref<1x256xf32, #tpu.memory_space<vmem>>, vector<1x256xf32>
      %23 = vector.broadcast %22 : vector<1x256xf32> to vector<128x256xf32>
      %24 = arith.addf %21, %23 : vector<128x256xf32>
      %c0_19 = arith.constant 0 : index
      %c0_20 = arith.constant 0 : index
      %25 = vector.load %arg7[%c0_19, %c0_20] : memref<128x256xf32, #tpu.memory_space<vmem>>, vector<128x256xf32>
      tpu.vector_store %arg7[%c0_19, %c0_20], %24 {strides = array<i32>} : memref<128x256xf32, #tpu.memory_space<vmem>>, vector<128x256xf32>,
    } else {
    }
    return
  }
  func.func @transform_0(%arg0: i32, %arg1: i32) -> (i32, i32) {
    %c0_i32 = arith.constant 0 : i32
    %c0_i32_0 = arith.constant 0 : i32
    return %arg0, %c0_i32 : i32, i32
  }
  func.func @transform_1(%arg0: i32, %arg1: i32) -> (i32, i32) {
    %c0_i32 = arith.constant 0 : i32
    %c0_i32_0 = arith.constant 0 : i32
    return %c0_i32, %arg1 : i32, i32
  }
  func.func @transform_2(%arg0: i32, %arg1: i32) -> (i32, i32) {
    %c0_i32 = arith.constant 0 : i32
    %c0_i32_0 = arith.constant 0 : i32
    return %c0_i32, %arg1 : i32, i32
  }
  func.func @transform_3(%arg0: i32, %arg1: i32) -> (i32, i32) {
    %c0_i32 = arith.constant 0 : i32
    %c0_i32_0 = arith.constant 0 : i32
    return %arg1, %c0_i32 : i32, i32
  }
  func.func @transform_4(%arg0: i32, %arg1: i32) -> (i32, i32) {
    %c0_i32 = arith.constant 0 : i32
    %c0_i32_0 = arith.constant 0 : i32
    %c0_i32_1 = arith.constant 0 : i32
    return %c0_i32, %c0_i32_0 : i32, i32
  }
  func.func @transform_5(%arg0: i32, %arg1: i32) -> (i32, i32) {
    %c0_i32 = arith.constant 0 : i32
    %c0_i32_0 = arith.constant 0 : i32
    return %arg0, %c0_i32 : i32, i32
  }
}

</mosaic_0001>

<bundles_post_ra>
// kernel: tpu_custom_call.1
= control target key start
LH: loop header
LB: loop body
LE: loop exit
PB: predicated region body
PF: predicated region fallthrough
CT: control target
= control target key end

     0   :  { %s3766_s0 = inlined_call_operand.hbm [shape: f32[512,256], index: 0, kind: input, shape index: {}]   ;;  %s3767_s1 = inlined_call_operand.hbm [shape: bf16[256,1024], index: 1, kind: input, shape index: {}]   ;;  %s3768_s2 = inlined_call_operand.hbm [shape: f32[1,1024], index: 2, kind: input, shape index: {}]   ;;  %s3769_s3 = inlined_call_operand.hbm [shape: bf16[1024,256], index: 3, kind: input, shape index: {}]   ;;  %s3770_s4 = inlined_call_operand.vmem [shape: f32[1,256], index: 4, kind: input, shape index: {}]   ;;  %s3771_s5 = inlined_call_operand.hbm [shape: f32[512,256], index: 5, kind: output, shape index: {}]  }
   0x1   :  { %3790 = sst [smem:[#allocation25_spill]] %s3767_s1 }
   0x2   :  { %3791 = sst [smem:[#allocation26_spill]] %s3770_s4 }
   0x3   :  { %3792 = sst [smem:[#allocation27_spill]] %s3771_s5 }
   0x4   :  { %10 = vsyncpa [#allocation4], 0 }
   0x5   :  { %12 = vsyncpa [#allocation4 + $0x1], 0 }
   0x6   :  { %13 = vsyncpa [#allocation7], 0 }
   0x7   :  { %15 = vsyncpa [#allocation7 + $0x1], 0 }
   0x8   :  { %16 = vsyncpa [#allocation10], 0 }
   0x9   :  { %18 = vsyncpa [#allocation10 + $0x1], 0 }
   0xa   :  { %19 = vsyncpa [#allocation5], 0 }
   0xb   :  { %21 = vsyncpa [#allocation5 + $0x1], 0  ;;  %s2984_s18 = smov 0   ;;  %s2986_s19 = smov 0  }
   0xc   :  { %s2988_s20 = smov 0   ;;  %s2990_s21 = smov 0  }
   0xd   :  { %s2992_s22 = smov 0   ;;  %s2994_s23 = smov 0  }
   0xe   :  { %s2996_s24 = smov 0   ;;  %s2998_s25 = smov 0  }
   0xf   :  { %s3000_s26 = smov 0   ;;  %s3002_s27 = smov 0  }
  0x10   :  { %s3004_s28 = smov 0  }
  0x11 LB: > { %3793 = sst [smem:[#allocation16_spill]] %s2907_s20  ;;  %p3774_p0 = scmp.eq.s32.totalorder %s2939_s28, 0  ;;  %s2939_s28 = sphi %s3004_s28, %s27_s28   ;;  %s2935_s27 = sphi %s3002_s27, %s3838_s27   ;;  %s2931_s26 = sphi %s3000_s26, %s3845_s26   ;;  %s2927_s25 = sphi %s2998_s25, %s3836_s25   ;;  %s2923_s24 = sphi %s2996_s24, %s3844_s24   ;;  %s2919_s23 = sphi %s2994_s23, %s3835_s23   ;;  %s2915_s22 = sphi %s2992_s22, %s3843_s22   ;;  %s2911_s21 = sphi %s2990_s21, %s3842_s21   ;;  %s2907_s20 = sphi %s2988_s20, %s3841_s20   ;;  %s2903_s19 = sphi %s2986_s19, %s3840_s19   ;;  %s2899_s18 = sphi %s2984_s18, %s3839_s18  }
  0x12   : > { %3794 = sst [smem:[#allocation17_spill]] %s2919_s23  ;;  %p79_p1 = scmp.ne.s32.totalorder %s2907_s20, %s2903_s19 }
  0x13   : > { %3795 = sst [smem:[#allocation18_spill]] %s2927_s25  ;;  %p3773_p3 = scmp.lt.s32.totalorder %s2939_s28, 8 }
  0x14   : > { %3796 = sst [smem:[#allocation19_spill]] %s2935_s27  ;;  %p81_p4 = por %p79_p1, %p3774_p0 }
  0x15   : > { %s233_s30 = sand.u32 1, %s2939_s28   ;;  %s3050_s6 = sand.u32 1, %s2907_s20  }
  0x16   : > { %s3772_s7 = sshll.u32 %s3050_s6, 9  ;;  %s2334_s8 = sshll.u32 %s2931_s26, 8 }
  0x17   : > { %s3797_s1 = sld [smem:[#allocation25_spill]]  ;;  %s237_s12 = scalar_lea.vmem [#allocation6], %s3772_s7 }
  0x18   : > { %s244_s13 = sshll.u32 %s237_s12, 4  ;;  %p3063_p5 = pnand %p3773_p3, %p81_p4  ;;  %s3067_s13 = int_to_ptr.vmem [resolvable:$true] %s244_s13 }
  0x19   : > { %s3070_s15 = scalar_lea.sflag [#allocation7], %s233_s30 }
  0x1a   : > { %s3798_s14 = scalar_select %p3063_p5, 1, 0 }
  0x1b   : > { %p3076_p8 = pneg %p3063_p5 }
  0x1d   : > { %s3057_s11 = scalar_lea.hbm %s3797_s1, %s2334_s8  ;;  %s2694_s10 = scalar_lea.hbm %s3797_s1, 16384 }
  0x1e   : > { %s2689_s16 = scalar_lea.hbm %s3057_s11, 8192  ;;  %p2695_p11 = scmp.lt.u32.totalorder %s3057_s11, %s3797_s1 }
  0x1f   : > { %p2690_p7 = scmp.ne.s32.totalorder %s3057_s11, %s2689_s16  ;;  %p2696_p12 = scmp.lt.u32.totalorder %s2694_s10, %s2689_s16 }
  0x20   : > { %p2698_p1 = scmp.lt.u32.totalorder %s2689_s16, %s3057_s11 }
  0x21   : > { %p2692_p9 = pnand %p3076_p8, %p2690_p7  ;;  %p2697_p13 = por %p2696_p12, %p2695_p11 }
  0x23   : > { %p2693_p10 = pneg %p2692_p9  ;;  %p2699_p4 = por %p2698_p1, %p2697_p13 }
  0x25   : > { %p2700_p3 = pnand %p2699_p4, %p2693_p10 }
  0x27   : > { %2703 = shalt.err (!%p2700_p3)
}
  0x28   : > { %s2704_s30 = scalar_lea.vmem %s3067_s13, 8192  ;;  %s2941_s8 = smov [#allocation6]  }
  0x29   : > { %p2705_p7 = scmp.ne.s32.totalorder %s3067_s13, %s2704_s30  ;;  %s2709_s9 = sshll.u32 %s2941_s8, 4  ;;  %s2710_s9 = int_to_ptr.vmem [resolvable:$false] %s2709_s9 }
  0x2a   : > { %s2711_s7 = scalar_lea.vmem %s2710_s9, 16384  ;;  %p2712_p0 = scmp.lt.s32.totalorder %s3067_s13, %s2710_s9 }
  0x2b   : > { %p2707_p9 = pnand %p2705_p7, %p3076_p8  ;;  %p2713_p6 = scmp.lt.s32.totalorder %s2711_s7, %s2704_s30 }
  0x2d   : > { %p2708_p2 = pneg %p2707_p9  ;;  %p2714_p11 = por %p2713_p6, %p2712_p0 }
  0x2f   : > { %p2715_p12 = pnand %p2714_p11, %p2708_p2 }
  0x31   : > { %2718 = shalt.err (!%p2715_p12)
}
  0x32   : > { %s2942_s16 = smov 512   ;;  %s3775_s10 = smov 256  }
  0x33   : > { %s3776_s12 = smov 16   ;;  %p293_p0 = scmp.lt.s32.totalorder %s2939_s28, 9 }
  0x34   : > { %2388 = dma.hbm_to_vmem [thread:$0]  (!%p3063_p5), %s3057_s11, 8192, %s3067_s13, %s3070_s15, %s2942_s16, %s3775_s10, %s3776_s12  }
  0x35   : > { %p3800_p2 = scmp.ge.s32.totalorder %s2939_s28, 1  ;;  %s3110_s8 = sadd.s32 4294967295, %s2939_s28  }
  0x36   : > { %s2173_s9 = sadd.s32 4294967294, %s2939_s28   ;;  %s36_s7 = sadd.s32 1, %s2931_s26 }
  0x37   : > { %p3105_p3 = pnand %p3800_p2, %p293_p0  ;;  %s39_s29 = sadd.s32 1, %s2935_s27 }
  0x38   : > { %p37_p6 = scmp.ge.s32.totalorder %s36_s7, 2  ;;  %s46_s11 = sadd.s32 1, %s2919_s23 }
  0x39   : > { %s3801_s30 = scalar_select %p3105_p3, 1, 0 }
  0x3a   : > { %p53_p10 = scmp.ne.s32.totalorder %s2919_s23, %s2915_s22  ;;  %p3778_p13 = scmp.ne.s32.totalorder %s2915_s22, %s2911_s21 }
  0x3b   : > { %s3847_s7 = smov (%p37_p6, %s36_s7), 0  ;;  %s3849_s29 = smov (!%p37_p6, %s39_s29), %s2935_s27 }
  0x3c   : > { %3802 = sst [smem:[#allocation20_spill]] %s3847_s7  ;;  %p3803_p1 = scmp.eq.s32.totalorder %s2939_s28, 0 }
  0x3d   : > { %p60_p7 = scmp.eq.s32.totalorder %s3110_s8, 0  ;;  %p41_p9 = scmp.ge.s32.totalorder %s3849_s29, 4 }
  0x3e   : > { %p3128_p4 = por %p3803_p1, %p53_p10  ;;  %s69_s16 = ssub.s32 %s2931_s26, %s3847_s7 }
  0x3f   : > { %p3138_p11 = por %p60_p7, %p3778_p13  ;;  %p70_p12 = scmp.eq.s32.totalorder %s69_s16, 0 }
  0x40   : > { %s3851_s29 = smov (%p41_p9, %s3849_s29), 0  ;;  %s3807_s12 = sadd.s32 1, %s2907_s20 }
  0x41   : > { %s3805_s10 = scalar_select %p3138_p11, 1, 0 }
  0x42   : > { %3806 = sst [smem:[#allocation21_spill]] %s3851_s29  ;;  %s43_s5 = ssub.s32 %s2935_s27, %s3851_s29 }
  0x43   : > { %s3147_s1 = scalar_select %p70_p12, %s2907_s20, %s3807_s12  }
  0x44   : > { %p3809_p0 = scmp.ne.s32.totalorder %s2903_s19, %s2899_s18  ;;  %p44_p6 = scmp.eq.s32.totalorder %s43_s5, 0 }
  0x45   : > { %3808 = sst [smem:[#allocation22_spill]] %s3147_s1  ;;  %p182_p1 = scmp.eq.s32.totalorder %s3110_s8, 7 }
  0x46   : > { %p3154_p2 = por %p3809_p0, %p60_p7  ;;  %p188_p13 = scmp.eq.s32.totalorder %s2173_s9, 7 }
  0x47   : > { %s211_s16 = sand.u32 1, %s2919_s23   ;;  %p3166_p9 = por %p182_p1, %p53_p10 }
  0x48   : > { %s3810_s25 = scalar_select %p3154_p2, 1, 0 }
  0x49   : > { %s3161_s7 = scalar_select %p44_p6, %s2919_s23, %s46_s11  }
  0x4a   : > { %s3812_s12 = scalar_select %p3166_p9, 1, 0 }
  0x4b   : > { %3811 = sst [smem:[#allocation23_spill]] %s3161_s7  ;;  %p3813_p12 = scmp.ne.s32.totalorder %s2915_s22, %s2911_s21 }
  0x4c   : > { %s2176_s29 = sshll.u32 %s211_s16, 8  ;;  %s2333_s1 = sshll.u32 %s2935_s27, 12 }
  0x4d   : > { %p3173_p11 = por %p188_p13, %p3813_p12  ;;  %s3181_s5 = scalar_lea.hbm %s3766_s0, %s2333_s1 }
  0x4e   : > { %s215_s9 = scalar_lea.vmem [#allocation3], %s2176_s29  ;;  %p3816_p10 = scmp.lt.s32.totalorder %s2939_s28, 8 }
  0x4f   : > { %s3814_s18 = scalar_select %p3173_p11, 1, 0 }
  0x50   : > { %s223_s11 = sshll.u32 %s215_s9, 4  ;;  %p3189_p13 = pnand %p3816_p10, %p3128_p4  ;;  %s3183_s11 = int_to_ptr.vmem [resolvable:$true] %s223_s11 }
  0x51   : > { %3815 = sst [smem:[#allocation24_spill]] %s3814_s18  ;;  %s2183_s27 = sshll.u32 %s3050_s6, 2 }
  0x52   : > { %s2335_s4 = sshll.u32 %s2931_s26, 6  ;;  %s3195_s1 = scalar_lea.sflag [#allocation4], %s211_s16 }
  0x53   : > { %s2719_s20 = scalar_lea.hbm %s3181_s5, 4096  ;;  %p2721_p0 = pneg %p3189_p13 }
  0x54   : > { %p2720_p7 = scmp.ne.s32.totalorder %s3181_s5, %s2719_s20  ;;  %s2724_s9 = scalar_lea.hbm %s3766_s0, 16384 }
  0x55   : > { %p2725_p4 = scmp.lt.u32.totalorder %s3181_s5, %s3766_s0  ;;  %p2726_p12 = scmp.lt.u32.totalorder %s2724_s9, %s2719_s20 }
  0x56   : > { %p2722_p6 = pnand %p2721_p0, %p2720_p7  ;;  %p2728_p11 = scmp.lt.u32.totalorder %s2719_s20, %s3181_s5 }
  0x57   : > { %p2727_p10 = por %p2726_p12, %p2725_p4 }
  0x58   : > { %p2723_p1 = pneg %p2722_p6 }
  0x59   : > { %p2729_p9 = por %p2728_p11, %p2727_p10 }
  0x5b   : > { %p2730_p2 = pnand %p2729_p9, %p2723_p1 }
  0x5d   : > { %2733 = shalt.err (!%p2730_p2)
}
  0x5e   : > { %s2734_s16 = scalar_lea.vmem %s3183_s11, 4096  ;;  %s2945_s29 = smov [#allocation3]  }
  0x5f   : > { %p2735_p7 = scmp.ne.s32.totalorder %s3183_s11, %s2734_s16  ;;  %s2739_s13 = sshll.u32 %s2945_s29, 4  ;;  %s2740_s13 = int_to_ptr.vmem [resolvable:$false] %s2739_s13 }
  0x60   : > { %s2741_s23 = scalar_lea.vmem %s2740_s13, 8192  ;;  %p2742_p5 = scmp.lt.s32.totalorder %s3183_s11, %s2740_s13 }
  0x61   : > { %p2737_p6 = pnand %p2735_p7, %p2721_p0  ;;  %p2743_p4 = scmp.lt.s32.totalorder %s2741_s23, %s2734_s16 }
  0x63   : > { %p2738_p3 = pneg %p2737_p6  ;;  %p2744_p12 = por %p2743_p4, %p2742_p5 }
  0x65   : > { %p2745_p11 = pnand %p2744_p12, %p2738_p3 }
  0x67   : > { %2748 = shalt.err (!%p2745_p11)
}
  0x68   : > { %s3818_s18 = smov 16   ;;  %s3819_s20 = smov 256  }
  0x69   : > { %2385 = dma.hbm_to_vmem [thread:$0]  (!%p3189_p13), %s3181_s5, 4096, %s3183_s11, %s3195_s1, %s3819_s20, %s3819_s20, %s3818_s18  }
  0x6a   : > { %s3231_s16 = scalar_lea.hbm %s3768_s2, %s2335_s4  ;;  %s258_s7 = scalar_lea.vmem [#allocation8], %s2183_s27 }
  0x6b   : > { %s266_s13 = sshll.u32 %s258_s7, 4  ;;  %s2749_s23 = scalar_lea.hbm %s3231_s16, 64  ;;  %s267_s13 = int_to_ptr.vmem [resolvable:$true] %s266_s13 }
  0x6c   : > { %p2750_p5 = scmp.ne.s32.totalorder %s3231_s16, %s2749_s23  ;;  %s2754_s1 = scalar_lea.hbm %s3768_s2, 128 }
  0x6d   : > { %p2755_p9 = scmp.lt.u32.totalorder %s3231_s16, %s3768_s2  ;;  %p2756_p13 = scmp.lt.u32.totalorder %s2754_s1, %s2749_s23 }
  0x6e   : > { %p2752_p3 = pnand %p2750_p5, %p3076_p8  ;;  %p2758_p1 = scmp.lt.u32.totalorder %s2749_s23, %s3231_s16 }
  0x6f   : > { %p2757_p0 = por %p2756_p13, %p2755_p9 }
  0x70   : > { %p2753_p2 = pneg %p2752_p3 }
  0x71   : > { %p2759_p10 = por %p2758_p1, %p2757_p0 }
  0x73   : > { %p2760_p7 = pnand %p2759_p10, %p2753_p2 }
  0x75   : > { %2763 = shalt.err (!%p2760_p7)
}
  0x76   : > { %s2764_s27 = scalar_lea.vmem %s267_s13, 64  ;;  %s2946_s20 = smov [#allocation8]  }
  0x77   : > { %p2765_p6 = scmp.ne.s32.totalorder %s267_s13, %s2764_s27  ;;  %s2769_s9 = sshll.u32 %s2946_s20, 4  ;;  %s2770_s9 = int_to_ptr.vmem [resolvable:$false] %s2769_s9 }
  0x78   : > { %s2771_s29 = scalar_lea.vmem %s2770_s9, 128  ;;  %p2772_p11 = scmp.lt.s32.totalorder %s267_s13, %s2770_s9 }
  0x79   : > { %p2767_p4 = pnand %p2765_p6, %p3076_p8  ;;  %p2773_p5 = scmp.lt.s32.totalorder %s2771_s29, %s2764_s27 }
  0x7b   : > { %p2768_p12 = pneg %p2767_p4  ;;  %p2774_p3 = por %p2773_p5, %p2772_p11 }
  0x7d   : > { %p2775_p9 = pnand %p2774_p3, %p2768_p12 }
  0x7f   : > { %2778 = shalt.err (!%p2775_p9)
}
  0x80   : > { %p3820_p13 = scmp.ne.s32.totalorder %s3798_s14, 0  ;;  %s2337_s7 = sshll.u32 %s2931_s26, 13 }
  0x81   : > { %s3257_s11 = scalar_lea.hbm %s3769_s3, %s2337_s7  ;;  %s3821_s1 = sshll.u32 %s3050_s6, 9 }
  0x82   : > { %2391 = dma.hbm_to_vmem [thread:$0]  (!%p3820_p13), %s3231_s16, 64, %s267_s13, %s3070_s15  }
  0x83   : > { %s277_s18 = scalar_lea.vmem [#allocation9], %s3821_s1  ;;  %s274_s27 = scalar_lea.sflag [#allocation10], %s3050_s6 }
  0x84   : > { %s285_s4 = sshll.u32 %s277_s18, 4  ;;  %s2779_s20 = scalar_lea.hbm %s3257_s11, 8192  ;;  %s3261_s4 = int_to_ptr.vmem [resolvable:$true] %s285_s4 }
  0x85   : > { %p2780_p2 = scmp.ne.s32.totalorder %s3257_s11, %s2779_s20  ;;  %s2784_s13 = scalar_lea.hbm %s3769_s3, 16384 }
  0x86   : > { %p2785_p10 = scmp.lt.u32.totalorder %s3257_s11, %s3769_s3  ;;  %p2786_p7 = scmp.lt.u32.totalorder %s2784_s13, %s2779_s20 }
  0x87   : > { %p2782_p0 = pnand %p2780_p2, %p3076_p8  ;;  %p2788_p4 = scmp.lt.u32.totalorder %s2779_s20, %s3257_s11 }
  0x88   : > { %p2787_p6 = por %p2786_p7, %p2785_p10 }
  0x89   : > { %p2783_p1 = pneg %p2782_p0 }
  0x8a   : > { %p2789_p12 = por %p2788_p4, %p2787_p6 }
  0x8c   : > { %p2790_p11 = pnand %p2789_p12, %p2783_p1 }
  0x8e   : > { %2793 = shalt.err (!%p2790_p11)
}
  0x8f   : > { %s2794_s7 = scalar_lea.vmem %s3261_s4, 8192  ;;  %s2947_s23 = smov [#allocation9]  }
  0x90   : > { %p2795_p5 = scmp.ne.s32.totalorder %s3261_s4, %s2794_s7  ;;  %s2799_s5 = sshll.u32 %s2947_s23, 4  ;;  %s2800_s5 = int_to_ptr.vmem [resolvable:$false] %s2799_s5 }
  0x91   : > { %s2801_s1 = scalar_lea.vmem %s2800_s5, 16384  ;;  %p2802_p2 = scmp.lt.s32.totalorder %s3261_s4, %s2800_s5 }
  0x92   : > { %p2797_p3 = pnand %p2795_p5, %p3076_p8  ;;  %p2803_p0 = scmp.lt.s32.totalorder %s2801_s1, %s2794_s7 }
  0x94   : > { %p2798_p9 = pneg %p2797_p3  ;;  %p2804_p10 = por %p2803_p0, %p2802_p2 }
  0x96   : > { %p2805_p7 = pnand %p2804_p10, %p2798_p9 }
  0x98   : > { %2808 = shalt.err (!%p2805_p7)
}
  0x99   : > { %s2948_s18 = smov 128   ;;  %s2949_s20 = smov 8  }
  0x9a   : > { %2394 = dma.hbm_to_vmem [thread:$0]  (!%p3820_p13), %s3257_s11, 8192, %s3261_s4, %s274_s27, %s2948_s18, %s2948_s18, %s2949_s20  }
  0x9b   : > { %p3822_p8 = scmp.ne.s32.totalorder %s3801_s30, 0 }
  0x9c   : > { %s3290_s17 = sand.u32 (!%p3822_p8), 1, %s2915_s22   ;;  %p3823_p1 = scmp.ne.s32.totalorder (!%p3822_p8), %s3805_s10, 0 }
  0x9d   : > { %297 = sbr.rel (%p3822_p8) target bundleno = 854 (0x356), region = 40  ;;  %s2191_s15 = sshll.u32 (!%p3822_p8), %s3290_s17, 8 }
  0x9e   : > { %s300_s16 = scalar_lea.sflag (!%p3822_p8), [#allocation4], %s3290_s17  ;;  %s3294_s13 = scalar_lea.vmem (!%p3822_p8), [#allocation3], %s2191_s15 }
  0xa4   : > { %2882 = dma.done.wait (%p3823_p1), %s300_s16, 4096  }
  0xa5   : > { %2884 = vsyncadd (%p3823_p1), %s300_s16, 4294963200  ;;  %s308_s6 = sand.u32 1, %s3110_s8   ;;  %s310_s14 = sand.u32 1, %s2903_s19  }
  0xa6   : > { %s2192_s30 = sshll.u32 %s310_s14, 9  ;;  %s309_s11 = scalar_lea.sflag [#allocation7], %s308_s6 }
  0xa7   : > { %s3302_s4 = scalar_lea.vmem [#allocation6], %s2192_s30  ;;  %p3824_p13 = scmp.ne.s32.totalorder %s3810_s25, 0 }
  0xa9   : > { %2886 = dma.done.wait (%p3824_p13), %s309_s11, 8256  }
  0xaa   : > { %2888 = vsyncadd (%p3824_p13), %s309_s11, 4294959040  ;;  %s2193_s27 = sshll.u32 %s310_s14, 2  ;;  %s327_s10 = scalar_lea.sflag [#allocation10], %s310_s14 }
  0xab   : > { %s3308_s9 = scalar_lea.vmem [#allocation8], %s2193_s27  ;;  %s3310_s29 = scalar_lea.vmem [#allocation9], %s2192_s30 }
  0xac   : > { %2890 = dma.done.wait (%p3824_p13), %s327_s10, 8192  }
  0xad   : > { %2892 = vsyncadd (%p3824_p13), %s327_s10, 4294959104  ;;  %s3316_s8 = scalar_lea.vmem [#allocation11], %s2191_s15  ;;  %p2196_p6 = scmp.ne.s32.totalorder %s2923_s24, 0 }
  0xae   : > { %v2950_v0 = vmov (!%p2196_p6), 0.0  }
  0xaf   : > { %380 = sbr.rel (%p2196_p6) target bundleno = 191 (0xbf), region = 60  ;;  %381 = vst [vmem:[#allocation2] sm:$0xff] (!%p2196_p6), %v2950_v0  ;;  %382 = vst [vmem:[#allocation2 + $0x8] sm:$0xff] (!%p2196_p6), %v2950_v0 }
  0xb0   : > { %383 = vst [vmem:[#allocation2 + $0x10] sm:$0xff] (!%p2196_p6), %v2950_v0  ;;  %384 = vst [vmem:[#allocation2 + $0x18] sm:$0xff] (!%p2196_p6), %v2950_v0 }
  0xb1   : > { %385 = vst [vmem:[#allocation2 + $0x20] sm:$0xff] (!%p2196_p6), %v2950_v0  ;;  %386 = vst [vmem:[#allocation2 + $0x28] sm:$0xff] (!%p2196_p6), %v2950_v0 }
  0xb2   : > { %387 = vst [vmem:[#allocation2 + $0x30] sm:$0xff] (!%p2196_p6), %v2950_v0  ;;  %388 = vst [vmem:[#allocation2 + $0x38] sm:$0xff] (!%p2196_p6), %v2950_v0 }
  0xb3   : > { %389 = vst [vmem:[#allocation2 + $0x40] sm:$0xff] (!%p2196_p6), %v2950_v0  ;;  %390 = vst [vmem:[#allocation2 + $0x48] sm:$0xff] (!%p2196_p6), %v2950_v0 }
  0xb4   : > { %391 = vst [vmem:[#allocation2 + $0x50] sm:$0xff] (!%p2196_p6), %v2950_v0  ;;  %392 = vst [vmem:[#allocation2 + $0x58] sm:$0xff] (!%p2196_p6), %v2950_v0 }
  0xb5   : > { %393 = vst [vmem:[#allocation2 + $0x60] sm:$0xff] (!%p2196_p6), %v2950_v0  ;;  %394 = vst [vmem:[#allocation2 + $0x68] sm:$0xff] (!%p2196_p6), %v2950_v0 }
  0xb6   : > { %395 = vst [vmem:[#allocation2 + $0x70] sm:$0xff] %v2950_v0  ;;  %396 = vst [vmem:[#allocation2 + $0x78] sm:$0xff] %v2950_v0 }
  0xb7   : > { %397 = vst [vmem:[#allocation2 + $0x80] sm:$0xff] %v2950_v0  ;;  %398 = vst [vmem:[#allocation2 + $0x88] sm:$0xff] %v2950_v0 }
  0xb8   : > { %399 = vst [vmem:[#allocation2 + $0x90] sm:$0xff] %v2950_v0  ;;  %400 = vst [vmem:[#allocation2 + $0x98] sm:$0xff] %v2950_v0 }
  0xb9   : > { %401 = vst [vmem:[#allocation2 + $0xa0] sm:$0xff] %v2950_v0  ;;  %402 = vst [vmem:[#allocation2 + $0xa8] sm:$0xff] %v2950_v0 }
  0xba   : > { %403 = vst [vmem:[#allocation2 + $0xb0] sm:$0xff] %v2950_v0  ;;  %404 = vst [vmem:[#allocation2 + $0xb8] sm:$0xff] %v2950_v0 }
  0xbb   : > { %405 = vst [vmem:[#allocation2 + $0xc0] sm:$0xff] %v2950_v0  ;;  %406 = vst [vmem:[#allocation2 + $0xc8] sm:$0xff] %v2950_v0 }
  0xbc   : > { %407 = vst [vmem:[#allocation2 + $0xd0] sm:$0xff] %v2950_v0  ;;  %408 = vst [vmem:[#allocation2 + $0xd8] sm:$0xff] %v2950_v0 }
  0xbd   : > { %409 = vst [vmem:[#allocation2 + $0xe0] sm:$0xff] %v2950_v0  ;;  %410 = vst [vmem:[#allocation2 + $0xe8] sm:$0xff] %v2950_v0 }
  0xbe   : > { %411 = vst [vmem:[#allocation2 + $0xf0] sm:$0xff] %v2950_v0  ;;  %412 = vst [vmem:[#allocation2 + $0xf8] sm:$0xff] %v2950_v0 }
  0xbf PF: > { %v2497_v1 = vld [vmem:[%s3302_s4 + $0x4] ss:$16 sps:$4 sm:$0xff]   ;;  %v2499_v2 = vld [vmem:[%s3302_s4] ss:$16 sps:$4 sm:$0xff]   ;;  %v414_v14 = vld [vmem:[%s3294_s13 + $0x8] sm:$0xff]  ;;  %p2325_p4 = scmp.ne.s32.totalorder %s2923_s24, 1 }
  0xc0   : > { %867 = vmatprep.subr.bf16.mxu1 %v2497_v1  ;;  %v2500_v3 = vld [vmem:[%s3302_s4 + $0x24] ss:$16 sps:$4 sm:$0xff]   ;;  %v2502_v4 = vld [vmem:[%s3302_s4 + $0x20] ss:$16 sps:$4 sm:$0xff]   ;;  %v416_v15 = vld [vmem:[%s3294_s13 + $0x18] sm:$0xff]  ;;  %s3825_s23 = sld [smem:[#allocation26_spill]] (!%p2325_p4) }
  0xc1   : > { %868 = vmatpush1.bf16.msra.mxu1 %v2499_v2  ;;  %v2503_v5 = vld [vmem:[%s3302_s4 + $0x44] ss:$16 sps:$4 sm:$0xff]   ;;  %v2505_v6 = vld [vmem:[%s3302_s4 + $0x40] ss:$16 sps:$4 sm:$0xff]   ;;  %v3334_v16 = vpack.c.bf16 %v416_v15, %v414_v14  ;;  %v2547_v41 = vld [vmem:[%s3302_s4 + $0xc] ss:$16 sps:$4 sm:$0xff]  }
  0xc2   : > { %869 = vmatprep.subr.bf16.mxu1 %v2500_v3  ;;  %v2506_v7 = vld [vmem:[%s3302_s4 + $0x64] ss:$16 sps:$4 sm:$0xff]   ;;  %v2508_v8 = vld [vmem:[%s3302_s4 + $0x60] ss:$16 sps:$4 sm:$0xff]   ;;  %v418_v42 = vld [vmem:[%s3294_s13 + $0x28] sm:$0xff] }
  0xc3   : > { %v2509_v9 = vld [vmem:[%s3302_s4 + $0x84] ss:$16 sps:$4 sm:$0xff]   ;;  %v2511_v10 = vld [vmem:[%s3302_s4 + $0x80] ss:$16 sps:$4 sm:$0xff]   ;;  %899 = vmatprep.mubr.bf16.mxu1 %v3334_v16  ;;  %v420_v43 = vld [vmem:[%s3294_s13 + $0x38] sm:$0xff] }
  0xc4   : > { %v2512_v11 = vld [vmem:[%s3302_s4 + $0xa4] ss:$16 sps:$4 sm:$0xff]   ;;  %v2514_v12 = vld [vmem:[%s3302_s4 + $0xa0] ss:$16 sps:$4 sm:$0xff]   ;;  %v2545_v47 = vld [vmem:[%s3302_s4 + $0x8] ss:$16 sps:$4 sm:$0xff]   ;;  %v3369_v48 = vpack.c.bf16 %v420_v43, %v418_v42 }
  0xc5   : > { %870 = vmatpush1.bf16.msra.mxu1 %v2502_v4  ;;  %v2515_v13 = vld [vmem:[%s3302_s4 + $0xc4] ss:$16 sps:$4 sm:$0xff]   ;;  %v2517_v17 = vld [vmem:[%s3302_s4 + $0xc0] ss:$16 sps:$4 sm:$0xff]   ;;  %v2550_v49 = vld [vmem:[%s3302_s4 + $0x2c] ss:$16 sps:$4 sm:$0xff]  }
  0xc6   : > { %871 = vmatprep.subr.bf16.mxu1 %v2503_v5  ;;  %v2518_v18 = vld [vmem:[%s3302_s4 + $0xe4] ss:$16 sps:$4 sm:$0xff]   ;;  %v2520_v19 = vld [vmem:[%s3302_s4 + $0xe0] ss:$16 sps:$4 sm:$0xff]   ;;  %v2548_v50 = vld [vmem:[%s3302_s4 + $0x28] ss:$16 sps:$4 sm:$0xff]  }
  0xc7   : > { %v2521_v20 = vld [vmem:[%s3302_s4 + $0x104] ss:$16 sps:$4 sm:$0xff]   ;;  %v2523_v21 = vld [vmem:[%s3302_s4 + $0x100] ss:$16 sps:$4 sm:$0xff]   ;;  %v2553_v55 = vld [vmem:[%s3302_s4 + $0x4c] ss:$16 sps:$4 sm:$0xff]  }
  0xc8   : > { %v2524_v22 = vld [vmem:[%s3302_s4 + $0x124] ss:$16 sps:$4 sm:$0xff]   ;;  %v2526_v23 = vld [vmem:[%s3302_s4 + $0x120] ss:$16 sps:$4 sm:$0xff]   ;;  %v422_v56 = vld [vmem:[%s3294_s13 + $0x48] sm:$0xff] }
  0xc9   : > { %872 = vmatpush1.bf16.msra.mxu1 %v2505_v6  ;;  %v2527_v24 = vld [vmem:[%s3302_s4 + $0x144] ss:$16 sps:$4 sm:$0xff]   ;;  %v2529_v25 = vld [vmem:[%s3302_s4 + $0x140] ss:$16 sps:$4 sm:$0xff]   ;;  %v424_v57 = vld [vmem:[%s3294_s13 + $0x58] sm:$0xff] }
  0xca   : > { %873 = vmatprep.subr.bf16.mxu1 %v2506_v7  ;;  %v2530_v26 = vld [vmem:[%s3302_s4 + $0x164] ss:$16 sps:$4 sm:$0xff]   ;;  %v2532_v27 = vld [vmem:[%s3302_s4 + $0x160] ss:$16 sps:$4 sm:$0xff]   ;;  %v2551_v60 = vld [vmem:[%s3302_s4 + $0x48] ss:$16 sps:$4 sm:$0xff]   ;;  %v3388_v63 = vpack.c.bf16 %v424_v57, %v422_v56 }
  0xcb   : > { %v2533_v28 = vld [vmem:[%s3302_s4 + $0x184] ss:$16 sps:$4 sm:$0xff]   ;;  %v2535_v29 = vld [vmem:[%s3302_s4 + $0x180] ss:$16 sps:$4 sm:$0xff]   ;;  %v2556_v62 = vld [vmem:[%s3302_s4 + $0x6c] ss:$16 sps:$4 sm:$0xff]  }
  0xcc   : > { %v2536_v30 = vld [vmem:[%s3302_s4 + $0x1a4] ss:$16 sps:$4 sm:$0xff]   ;;  %v2538_v31 = vld [vmem:[%s3302_s4 + $0x1a0] ss:$16 sps:$4 sm:$0xff]   ;;  %v2554_v2 = vld [vmem:[%s3302_s4 + $0x68] ss:$16 sps:$4 sm:$0xff]  }
  0xcd   : > { %874 = vmatpush1.bf16.msra.mxu1 %v2508_v8  ;;  %v2539_v32 = vld [vmem:[%s3302_s4 + $0x1c4] ss:$16 sps:$4 sm:$0xff]   ;;  %v2541_v33 = vld [vmem:[%s3302_s4 + $0x1c0] ss:$16 sps:$4 sm:$0xff]   ;;  %v2559_v5 = vld [vmem:[%s3302_s4 + $0x8c] ss:$16 sps:$4 sm:$0xff]  }
  0xce   : > { %875 = vmatprep.subr.bf16.mxu1 %v2509_v9  ;;  %v2542_v34 = vld [vmem:[%s3302_s4 + $0x1e4] ss:$16 sps:$4 sm:$0xff]   ;;  %v2595_v36 = vld [vmem:[%s3310_s29] ss:$8 sps:$4 sm:$0xff]   ;;  %v2598_v44 = vld [vmem:[%s3310_s29 + $0x10] ss:$8 sps:$4 sm:$0xff]  }
  0xcf   : > { %v2593_v35 = vld [vmem:[%s3310_s29 + $0x4] ss:$8 sps:$4 sm:$0xff]   ;;  %v2596_v37 = vld [vmem:[%s3310_s29 + $0x14] ss:$8 sps:$4 sm:$0xff]   ;;  %v2544_v38 = vld [vmem:[%s3302_s4 + $0x1e0] ss:$16 sps:$4 sm:$0xff]  }
  0xd0   : > { %v413_v39 = vld [vmem:[%s3294_s13] sm:$0xff]  ;;  %v415_v40 = vld [vmem:[%s3294_s13 + $0x10] sm:$0xff]  ;;  %1605 = vmatprep.subr.bf16.mxu0 %v2593_v35  ;;  %v426_v6 = vld [vmem:[%s3294_s13 + $0x68] sm:$0xff] }
  0xd1   : > { %876 = vmatpush1.bf16.msra.mxu1 %v2511_v10  ;;  %1606 = vmatpush1.bf16.msra.mxu0 %v2595_v36  ;;  %v3365_v45 = vpack.c.bf16 %v415_v40, %v413_v39  ;;  %v2599_v46 = vld [vmem:[%s3310_s29 + $0x24] ss:$8 sps:$4 sm:$0xff]   ;;  %v417_v51 = vld [vmem:[%s3294_s13 + $0x20] sm:$0xff]  ;;  %v2601_v52 = vld [vmem:[%s3310_s29 + $0x20] ss:$8 sps:$4 sm:$0xff]  }
  0xd2   : > { %877 = vmatprep.subr.bf16.mxu1 %v2512_v11  ;;  %1607 = vmatprep.subr.bf16.mxu0 %v2596_v37  ;;  %v419_v53 = vld [vmem:[%s3294_s13 + $0x30] sm:$0xff]  ;;  %v2602_v54 = vld [vmem:[%s3310_s29 + $0x34] ss:$8 sps:$4 sm:$0xff]   ;;  %v2604_v58 = vld [vmem:[%s3310_s29 + $0x30] ss:$8 sps:$4 sm:$0xff]  }
  0xd3   : > { %v3383_v59 = vpack.c.bf16 %v419_v53, %v417_v51  ;;  %v2605_v61 = vld [vmem:[%s3310_s29 + $0x44] ss:$8 sps:$4 sm:$0xff]   ;;  %v2607_v0 = vld [vmem:[%s3310_s29 + $0x40] ss:$8 sps:$4 sm:$0xff]   ;;  %v2608_v1 = vld [vmem:[%s3310_s29 + $0x54] ss:$8 sps:$4 sm:$0xff]  }
  0xd4   : > { %v421_v3 = vld [vmem:[%s3294_s13 + $0x40] sm:$0xff]  ;;  %v423_v4 = vld [vmem:[%s3294_s13 + $0x50] sm:$0xff]  ;;  %v428_v7 = vld [vmem:[%s3294_s13 + $0x78] sm:$0xff] }
  0xd5   : > { %878 = vmatpush1.bf16.msra.mxu1 %v2514_v12  ;;  %1608 = vmatpush1.bf16.msra.mxu0 %v2598_v44  ;;  %v2610_v8 = vld [vmem:[%s3310_s29 + $0x50] ss:$8 sps:$4 sm:$0xff]   ;;  %v2611_v9 = vld [vmem:[%s3310_s29 + $0x64] ss:$8 sps:$4 sm:$0xff]   ;;  %v3403_v11 = vpack.c.bf16 %v423_v4, %v421_v3  ;;  %v2613_v14 = vld [vmem:[%s3310_s29 + $0x60] ss:$8 sps:$4 sm:$0xff]  }
  0xd6   : > { %879 = vmatprep.subr.bf16.mxu1 %v2515_v13  ;;  %1609 = vmatprep.subr.bf16.mxu0 %v2599_v46  ;;  %v2557_v10 = vld [vmem:[%s3302_s4 + $0x88] ss:$16 sps:$4 sm:$0xff]   ;;  %v2562_v12 = vld [vmem:[%s3302_s4 + $0xac] ss:$16 sps:$4 sm:$0xff]   ;;  %v3406_v13 = vpack.c.bf16 %v428_v7, %v426_v6 }
  0xd7   : > { %v2614_v15 = vld [vmem:[%s3310_s29 + $0x74] ss:$8 sps:$4 sm:$0xff]   ;;  %v434_v35 = vld [vmem:[%s3294_s13 + $0xa8] sm:$0xff]  ;;  %v2622_v37 = vld [vmem:[%s3310_s29 + $0x90] ss:$8 sps:$4 sm:$0xff]  }
  0xd8   : > { %v436_v36 = vld [vmem:[%s3294_s13 + $0xb8] sm:$0xff]  ;;  %v2623_v39 = vld [vmem:[%s3310_s29 + $0xa4] ss:$8 sps:$4 sm:$0xff]   ;;  %v2625_v43 = vld [vmem:[%s3310_s29 + $0xa0] ss:$8 sps:$4 sm:$0xff]  }
  0xd9   : > { %880 = vmatpush1.bf16.msra.mxu1 %v2517_v17  ;;  %1610 = vmatpush1.bf16.msra.mxu0 %v2601_v52  ;;  %v2560_v17 = vld [vmem:[%s3302_s4 + $0xa8] ss:$16 sps:$4 sm:$0xff]   ;;  %v2574_v42 = vld [vmem:[%s3302_s4 + $0x12c] ss:$16 sps:$4 sm:$0xff]  }
  0xda   : > { %881 = vmatprep.subr.bf16.mxu1 %v2518_v18  ;;  %1611 = vmatprep.subr.bf16.mxu0 %v2602_v54  ;;  %v425_v18 = vld [vmem:[%s3294_s13 + $0x60] sm:$0xff]  ;;  %v2569_v40 = vld [vmem:[%s3302_s4 + $0x108] ss:$16 sps:$4 sm:$0xff]  }
  0xdb   : > { %v2626_v44 = vld [vmem:[%s3310_s29 + $0xb4] ss:$8 sps:$4 sm:$0xff]   ;;  %v2572_v46 = vld [vmem:[%s3302_s4 + $0x128] ss:$16 sps:$4 sm:$0xff]  }
  0xdc   : > { %v438_v51 = vld [vmem:[%s3294_s13 + $0xc8] sm:$0xff]  ;;  %v440_v52 = vld [vmem:[%s3294_s13 + $0xd8] sm:$0xff] }
  0xdd   : > { %882 = vmatpush1.bf16.msra.mxu1 %v2520_v19  ;;  %1612 = vmatpush1.bf16.msra.mxu0 %v2604_v58  ;;  %v427_v19 = vld [vmem:[%s3294_s13 + $0x70] sm:$0xff]  ;;  %v2628_v53 = vld [vmem:[%s3310_s29 + $0xb0] ss:$8 sps:$4 sm:$0xff]   ;;  %v3459_v57 = vpack.c.bf16 %v440_v52, %v438_v51  ;;  %v2580_v58 = vld [vmem:[%s3302_s4 + $0x16c] ss:$16 sps:$4 sm:$0xff]  }
  0xde   : > { %883 = vmatprep.subr.bf16.mxu1 %v2521_v20  ;;  %1613 = vmatprep.subr.bf16.mxu0 %v2605_v61  ;;  %v2565_v20 = vld [vmem:[%s3302_s4 + $0xcc] ss:$16 sps:$4 sm:$0xff]   ;;  %v2575_v56 = vld [vmem:[%s3302_s4 + $0x148] ss:$16 sps:$4 sm:$0xff]  }
  0xdf   : > { %v2632_v61 = vld [vmem:[%s3310_s29 + $0xd4] ss:$8 sps:$4 sm:$0xff]   ;;  %v442_v3 = vld [vmem:[%s3294_s13 + $0xe8] sm:$0xff]  ;;  %v2644_v52 = vld [vmem:[%s3310_s29 + $0x110] ss:$8 sps:$4 sm:$0xff]  }
  0xe0   : > { %v444_v4 = vld [vmem:[%s3294_s13 + $0xf8] sm:$0xff] }
  0xe1   : > { %884 = vmatpush1.bf16.msra.mxu1 %v2523_v21  ;;  %1614 = vmatpush1.bf16.msra.mxu0 %v2607_v0  ;;  %v430_v21 = vld [vmem:[%s3294_s13 + $0x88] sm:$0xff]  ;;  %v437_v0 = vld [vmem:[%s3294_s13 + $0xc0] sm:$0xff]  ;;  %v460_v7 = vpack.c.bf16 %v444_v4, %v442_v3 }
  0xe2   : > { %885 = vmatprep.subr.bf16.mxu1 %v2524_v22  ;;  %1615 = vmatprep.subr.bf16.mxu0 %v2608_v1  ;;  %v432_v22 = vld [vmem:[%s3294_s13 + $0x98] sm:$0xff]  ;;  %v439_v1 = vld [vmem:[%s3294_s13 + $0xd0] sm:$0xff] }
  0xe3   : > { %v2581_v6 = vld [vmem:[%s3302_s4 + $0x188] ss:$16 sps:$4 sm:$0xff]  }
  0xe5   : > { %886 = vmatpush1.bf16.msra.mxu1 %v2526_v23  ;;  %1616 = vmatpush1.bf16.msra.mxu0 %v2610_v8  ;;  %v2616_v23 = vld [vmem:[%s3310_s29 + $0x70] ss:$8 sps:$4 sm:$0xff]   ;;  %v2586_v8 = vld [vmem:[%s3302_s4 + $0x1ac] ss:$16 sps:$4 sm:$0xff]  }
  0xe6   : > { %887 = vmatprep.subr.bf16.mxu1 %v2527_v24  ;;  %1617 = vmatprep.subr.bf16.mxu0 %v2611_v9  ;;  %v3419_v24 = vpack.c.bf16 %v427_v19, %v425_v18  ;;  %v2584_v9 = vld [vmem:[%s3302_s4 + $0x1a8] ss:$16 sps:$4 sm:$0xff]   ;;  %v2592_v18 = vld [vmem:[%s3302_s4 + $0x1ec] ss:$16 sps:$4 sm:$0xff]  }
  0xe7   : > { %v2590_v19 = vld [vmem:[%s3302_s4 + $0x1e8] ss:$16 sps:$4 sm:$0xff]  }
  0xe9   : > { %888 = vmatpush1.bf16.msra.mxu1 %v2529_v25  ;;  %1618 = vmatpush1.bf16.msra.mxu0 %v2613_v14  ;;  %v2617_v25 = vld [vmem:[%s3310_s29 + $0x84] ss:$8 sps:$4 sm:$0xff]  }
  0xea   : > { %889 = vmatprep.subr.bf16.mxu1 %v2530_v26  ;;  %1619 = vmatprep.subr.bf16.mxu0 %v2614_v15  ;;  %v2563_v26 = vld [vmem:[%s3302_s4 + $0xc8] ss:$16 sps:$4 sm:$0xff]   ;;  %v2589_v14 = vld [vmem:[%s3302_s4 + $0x1cc] ss:$16 sps:$4 sm:$0xff]  }
  0xed   : > { %890 = vmatpush1.bf16.msra.mxu1 %v2532_v27  ;;  %v3423_v27 = vpack.c.bf16 %v432_v22, %v430_v21  ;;  %1620 = vmatpush1.bf16.msra.mxu0 %v2616_v23  ;;  %v2637_v21 = vld [vmem:[%s3310_s29 + $0xe0] ss:$8 sps:$4 sm:$0xff]   ;;  %v3504_v22 = vld [vmem:[%s3308_s9] sm:$0xf] }
  0xee   : > { %891 = vmatprep.subr.bf16.mxu1 %v2533_v28  ;;  %v2568_v28 = vld [vmem:[%s3302_s4 + $0xec] ss:$16 sps:$4 sm:$0xff]   ;;  %1621 = vmatprep.subr.bf16.mxu0 %v2617_v25 }
  0xf1   : > { %892 = vmatpush1.bf16.msra.mxu1 %v2535_v29  ;;  %v2619_v29 = vld [vmem:[%s3310_s29 + $0x80] ss:$8 sps:$4 sm:$0xff]  }
  0xf2   : > { %893 = vmatprep.subr.bf16.mxu1 %v2536_v30  ;;  %v2620_v30 = vld [vmem:[%s3310_s29 + $0x94] ss:$8 sps:$4 sm:$0xff]   ;;  %1622 = vmatpush1.bf16.msra.mxu0 %v2619_v29 }
  0xf3   : > { %1623 = vmatprep.subr.bf16.mxu0 %v2620_v30 }
  0xf5   : > { %894 = vmatpush1.bf16.msra.mxu1 %v2538_v31  ;;  %v2566_v31 = vld [vmem:[%s3302_s4 + $0xe8] ss:$16 sps:$4 sm:$0xff]  }
  0xf6   : > { %895 = vmatprep.subr.bf16.mxu1 %v2539_v32  ;;  %v429_v32 = vld [vmem:[%s3294_s13 + $0x80] sm:$0xff]  ;;  %1624 = vmatpush1.bf16.msra.mxu0 %v2622_v37 }
  0xf7   : > { %1625 = vmatprep.subr.bf16.mxu0 %v2623_v39 }
  0xf9   : > { %896 = vmatpush1.bf16.msra.mxu1 %v2541_v33  ;;  %v431_v33 = vld [vmem:[%s3294_s13 + $0x90] sm:$0xff] }
  0xfa   : > { %897 = vmatprep.subr.bf16.mxu1 %v2542_v34  ;;  %v2571_v34 = vld [vmem:[%s3302_s4 + $0x10c] ss:$16 sps:$4 sm:$0xff]   ;;  %1626 = vmatpush1.bf16.msra.mxu0 %v2625_v43 }
  0xfb   : > { %1627 = vmatprep.subr.bf16.mxu0 %v2626_v44  ;;  %v2646_v44 = vld [vmem:[%s3310_s29 + $0x114] ss:$8 sps:$4 sm:$0xff]  }
  0xfd   : > { %898 = vmatpush1.bf16.msra.mxu1 %v2544_v38  ;;  %v3437_v38 = vpack.c.bf16 %v431_v33, %v429_v32 }
  0xfe   : > { %980 = vmatprep.subr.bf16.mxu1 %v2547_v41  ;;  %v3441_v41 = vpack.c.bf16 %v436_v36, %v434_v35  ;;  %1628 = vmatpush1.bf16.msra.mxu0 %v2628_v53 }
 0x100   : > { %900 = vmatmul.mubr.bf16.vlgmr.msra.gmra.mrb[0].mxu1 %v3365_v45 }
 0x101   : > { %981 = vmatpush1.bf16.msra.mxu1 %v2545_v47  ;;  %909 = vmatprep.mubr.bf16.mxu1 %v3369_v48  ;;  %v433_v47 = vld [vmem:[%s3294_s13 + $0xa0] sm:$0xff] }
 0x102   : > { %982 = vmatprep.subr.bf16.mxu1 %v2550_v49  ;;  %v435_v49 = vld [vmem:[%s3294_s13 + $0xb0] sm:$0xff] }
 0x103   : > { %v3455_v54 = vpack.c.bf16 %v435_v49, %v433_v47 }
 0x105   : > { %983 = vmatpush1.bf16.msra.mxu1 %v2548_v50  ;;  %v2577_v50 = vld [vmem:[%s3302_s4 + $0x14c] ss:$16 sps:$4 sm:$0xff]  }
 0x106   : > { %984 = vmatprep.subr.bf16.mxu1 %v2553_v55  ;;  %v2629_v55 = vld [vmem:[%s3310_s29 + $0xc4] ss:$8 sps:$4 sm:$0xff]  }
 0x107   : > { %1629 = vmatprep.subr.bf16.mxu0 %v2629_v55  ;;  %v2649_v55 = vld [vmem:[%s3310_s29 + $0x124] ss:$8 sps:$4 sm:$0xff]  }
 0x108   : > { %910 = vmatmul.mubr.bf16.gmra.mrb[4].mxu1 %v3383_v59 }
 0x109   : > { %985 = vmatpush1.bf16.msra.mxu1 %v2551_v60  ;;  %919 = vmatprep.mubr.bf16.mxu1 %v3388_v63  ;;  %v2631_v60 = vld [vmem:[%s3310_s29 + $0xc0] ss:$8 sps:$4 sm:$0xff]  }
 0x10a   : > { %986 = vmatprep.subr.bf16.mxu1 %v2556_v62  ;;  %v2578_v62 = vld [vmem:[%s3302_s4 + $0x168] ss:$16 sps:$4 sm:$0xff]   ;;  %1630 = vmatpush1.bf16.msra.mxu0 %v2631_v60 }
 0x10b   : > { %1631 = vmatprep.subr.bf16.mxu0 %v2632_v61 }
 0x10d   : > { %987 = vmatpush1.bf16.msra.mxu1 %v2554_v2  ;;  %v2583_v2 = vld [vmem:[%s3302_s4 + $0x18c] ss:$16 sps:$4 sm:$0xff]  }
 0x10e   : > { %988 = vmatprep.subr.bf16.mxu1 %v2559_v5  ;;  %v457_v5 = vpack.c.bf16 %v439_v1, %v437_v0 }
 0x110   : > { %920 = vmatmul.mubr.bf16.gmra.mrb[8].mxu1 %v3403_v11 }
 0x111   : > { %989 = vmatpush1.bf16.msra.mxu1 %v2557_v10  ;;  %929 = vmatprep.mubr.bf16.mxu1 %v3406_v13  ;;  %v441_v10 = vld [vmem:[%s3294_s13 + $0xe0] sm:$0xff] }
 0x112   : > { %990 = vmatprep.subr.bf16.mxu1 %v2562_v12  ;;  %v443_v12 = vld [vmem:[%s3294_s13 + $0xf0] sm:$0xff] }
 0x113   : > { %v459_v15 = vpack.c.bf16 %v443_v12, %v441_v10  ;;  %v2655_v12 = vld [vmem:[%s3310_s29 + $0x144] ss:$8 sps:$4 sm:$0xff]  }
 0x115   : > { %991 = vmatpush1.bf16.msra.mxu1 %v2560_v17  ;;  %v2587_v17 = vld [vmem:[%s3302_s4 + $0x1c8] ss:$16 sps:$4 sm:$0xff]  }
 0x116   : > { %992 = vmatprep.subr.bf16.mxu1 %v2565_v20  ;;  %v2634_v20 = vld [vmem:[%s3310_s29 + $0xd0] ss:$8 sps:$4 sm:$0xff]  }
 0x117   : > { %1632 = vmatpush1.bf16.msra.mxu0 %v2634_v20  ;;  %v2653_v20 = vld [vmem:[%s3310_s29 + $0x140] ss:$8 sps:$4 sm:$0xff]  }
 0x118   : > { %930 = vmatmul.mubr.bf16.gmra.mrb[12].mxu1 %v3419_v24 }
 0x119   : > { %993 = vmatpush1.bf16.msra.mxu1 %v2563_v26  ;;  %939 = vmatprep.mubr.bf16.mxu1 %v3423_v27 }
 0x11a   : > { %994 = vmatprep.subr.bf16.mxu1 %v2568_v28 }
 0x11d   : > { %995 = vmatpush1.bf16.msra.mxu1 %v2566_v31 }
 0x11e   : > { %996 = vmatprep.subr.bf16.mxu1 %v2571_v34 }
 0x120   : > { %940 = vmatmul.mubr.bf16.gmra.mrb[16].mxu1 %v3437_v38 }
 0x121   : > { %997 = vmatpush1.bf16.msra.mxu1 %v2569_v40  ;;  %949 = vmatprep.mubr.bf16.mxu1 %v3441_v41 }
 0x122   : > { %998 = vmatprep.subr.bf16.mxu1 %v2574_v42 }
 0x125   : > { %999 = vmatpush1.bf16.msra.mxu1 %v2572_v46 }
 0x126   : > { %1000 = vmatprep.subr.bf16.mxu1 %v2577_v50 }
 0x128   : > { %950 = vmatmul.mubr.bf16.gmra.mrb[20].mxu1 %v3455_v54 }
 0x129   : > { %1001 = vmatpush1.bf16.msra.mxu1 %v2575_v56  ;;  %959 = vmatprep.mubr.bf16.mxu1 %v3459_v57 }
 0x12a   : > { %1002 = vmatprep.subr.bf16.mxu1 %v2580_v58 }
 0x12d   : > { %1003 = vmatpush1.bf16.msra.mxu1 %v2578_v62  ;;  %v2647_v62 = vld [vmem:[%s3310_s29 + $0x120] ss:$8 sps:$4 sm:$0xff]  }
 0x12e   : > { %1004 = vmatprep.subr.bf16.mxu1 %v2583_v2  ;;  %v2652_v2 = vld [vmem:[%s3310_s29 + $0x134] ss:$8 sps:$4 sm:$0xff]  }
 0x130   : > { %960 = vmatmul.mubr.bf16.gmra.mrb[24].mxu1 %v457_v5 }
 0x131   : > { %1005 = vmatpush1.bf16.msra.mxu1 %v2581_v6  ;;  %969 = vmatprep.mubr.bf16.mxu1 %v460_v7 }
 0x132   : > { %1006 = vmatprep.subr.bf16.mxu1 %v2586_v8  ;;  %v2650_v8 = vld [vmem:[%s3310_s29 + $0x130] ss:$8 sps:$4 sm:$0xff]  }
 0x135   : > { %1007 = vmatpush1.bf16.msra.mxu1 %v2584_v9 }
 0x136   : > { %1008 = vmatprep.subr.bf16.mxu1 %v2589_v14 }
 0x138   : > { %970 = vmatmul.mubr.bf16.gmra.mrb[28].mxu1 %v459_v15 }
 0x139   : > { %1009 = vmatpush1.bf16.msra.mxu1 %v2587_v17  ;;  %1012 = vmatprep.mubr.bf16.mxu1 %v3334_v16  ;;  %v2635_v16 = vld [vmem:[%s3310_s29 + $0xe4] ss:$8 sps:$4 sm:$0xff]  }
 0x13a   : > { %1010 = vmatprep.subr.bf16.mxu1 %v2592_v18  ;;  %1633 = vmatprep.subr.bf16.mxu0 %v2635_v16 }
 0x13b   : > { %1634 = vmatpush1.bf16.msra.mxu0 %v2637_v21 }
 0x13d   : > { %1011 = vmatpush1.bf16.msra.mxu1 %v2590_v19 }
 0x140   : > { %1013 = vmatmul.mubr.bf16.vlgmr.msra.gmra.mrb[32].mxu1 %v3365_v45  ;;  %v2638_v45 = vld [vmem:[%s3310_s29 + $0xf4] ss:$8 sps:$4 sm:$0xff]  }
 0x141   : > { %1022 = vmatprep.mubr.bf16.mxu1 %v3369_v48  ;;  %v2640_v48 = vld [vmem:[%s3310_s29 + $0xf0] ss:$8 sps:$4 sm:$0xff]   ;;  %1635 = vmatprep.subr.bf16.mxu0 %v2638_v45  ;;  %v2658_v45 = vld [vmem:[%s3310_s29 + $0x154] ss:$8 sps:$4 sm:$0xff]  }
 0x142   : > { %1636 = vmatpush1.bf16.msra.mxu0 %v2640_v48 }
 0x148   : > { %1023 = vmatmul.mubr.bf16.gmra.mrb[36].mxu1 %v3383_v59  ;;  %v2643_v59 = vld [vmem:[%s3310_s29 + $0x104] ss:$8 sps:$4 sm:$0xff]  }
 0x149   : > { %1032 = vmatprep.mubr.bf16.mxu1 %v3388_v63  ;;  %1718 = vmatprep.subr.bf16.mxu0 %v2643_v59  ;;  %v527_v63 = vlaneseq }
 0x150   : > { %1033 = vmatmul.mubr.bf16.gmra.mrb[40].mxu1 %v3403_v11  ;;  %v3500_v11 = vshrl.u32 %v527_v63, 7 }
 0x151   : > { %1042 = vmatprep.mubr.bf16.mxu1 %v3406_v13 }
 0x152   : > { %v529_v13 = vsub.s32 0, %v3500_v11  ;;  %v533_v23 = vsub.s32 1, %v3500_v11 }
 0x154   : > { %v3515_v25 = vrot.slane %v3504_v22, %v533_v23 }
 0x158   : > { %1043 = vmatmul.mubr.bf16.gmra.mrb[44].mxu1 %v3419_v24  ;;  %v3510_v24 = vrot.slane %v3504_v22, %v529_v13 }
 0x159   : > { %1052 = vmatprep.mubr.bf16.mxu1 %v3423_v27 }
 0x160   : > { %1053 = vmatmul.mubr.bf16.gmra.mrb[48].mxu1 %v3437_v38 }
 0x161   : > { %1062 = vmatprep.mubr.bf16.mxu1 %v3441_v41  ;;  %v2641_v41 = vld [vmem:[%s3310_s29 + $0x100] ss:$8 sps:$4 sm:$0xff]  }
 0x168   : > { %1063 = vmatmul.mubr.bf16.gmra.mrb[52].mxu1 %v3455_v54 }
 0x169   : > { %1072 = vmatprep.mubr.bf16.mxu1 %v3459_v57 }
 0x170   : > { %1073 = vmatmul.mubr.bf16.gmra.mrb[56].mxu1 %v457_v5 }
 0x171   : > { %1082 = vmatprep.mubr.bf16.mxu1 %v460_v7 }
 0x178   : > { %1083 = vmatmul.mubr.bf16.gmra.mrb[60].mxu1 %v459_v15 }
 0x1d3   : > { %v901_v26 = vpop.f32.mrb[0].mxu1 }
 0x1d4   : > { %v902_v27 = vadd.f32 %v901_v26, %v3510_v24  ;;  %v903_v28 = vpop.f32.mrb[1].mxu1 }
 0x1d5   : > { %v904_v29 = vadd.f32 %v903_v28, %v3515_v25  ;;  %v905_v30 = vpop.f32.mrb[2].mxu1  ;;  %v2656_v28 = vld [vmem:[%s3310_s29 + $0x150] ss:$8 sps:$4 sm:$0xff]  }
 0x1d6   : > { %v906_v31 = vadd.f32 %v905_v30, %v3510_v24  ;;  %v907_v32 = vpop.f32.mrb[3].mxu1  ;;  %v1093_v34 = vmax.f32 %v902_v27, 0.0 }
 0x1d7   : > { %v908_v33 = vadd.f32 %v907_v32, %v3515_v25  ;;  %v1094_v36 = vmax.f32 %v904_v29, 0.0 }
 0x1d8   : > { %v1097_v35 = vmax.f32 %v906_v31, 0.0  ;;  %v2661_v31 = vld [vmem:[%s3310_s29 + $0x164] ss:$8 sps:$4 sm:$0xff]  }
 0x1d9   : > { %v1098_v37 = vmax.f32 %v908_v33, 0.0 }
 0x1da   : > { %v1189_v38 = vpack.c.bf16 %v1097_v35, %v1093_v34 }
 0x1db   : > { %v911_v39 = vpop.f32.mrb[4].mxu1  ;;  %v1190_v40 = vpack.c.bf16 %v1098_v37, %v1094_v36  ;;  %v2659_v37 = vld [vmem:[%s3310_s29 + $0x160] ss:$8 sps:$4 sm:$0xff]  }
 0x1dc   : > { %v912_v42 = vadd.f32 %v911_v39, %v3510_v24  ;;  %v913_v43 = vpop.f32.mrb[5].mxu1 }
 0x1dd   : > { %v914_v46 = vadd.f32 %v913_v43, %v3515_v25  ;;  %v915_v47 = vpop.f32.mrb[6].mxu1  ;;  %1637 = vmatprep.mubr.bf16.mxu0 %v1190_v40  ;;  %v2664_v40 = vld [vmem:[%s3310_s29 + $0x174] ss:$8 sps:$4 sm:$0xff]  }
 0x1de   : > { %v916_v49 = vadd.f32 %v915_v47, %v3510_v24  ;;  %v917_v50 = vpop.f32.mrb[7].mxu1  ;;  %1638 = vmatmul.mubr.bf16.vlgmr.msra.gmra.mrb[0].mxu0 %v1189_v38  ;;  %v1101_v53 = vmax.f32 %v912_v42, 0.0  ;;  %v2662_v47 = vld [vmem:[%s3310_s29 + $0x170] ss:$8 sps:$4 sm:$0xff]  }
 0x1df   : > { %v918_v51 = vadd.f32 %v917_v50, %v3515_v25  ;;  %1719 = vmatpush1.bf16.msra.mxu0 %v2641_v41  ;;  %v1102_v56 = vmax.f32 %v914_v46, 0.0 }
 0x1e0   : > { %v1105_v54 = vmax.f32 %v916_v49, 0.0  ;;  %1720 = vmatprep.subr.bf16.mxu0 %v2646_v44 }
 0x1e1   : > { %v1106_v57 = vmax.f32 %v918_v51, 0.0  ;;  %v2667_v51 = vld [vmem:[%s3310_s29 + $0x184] ss:$8 sps:$4 sm:$0xff]  }
 0x1e2   : > { %v1193_v58 = vpack.c.bf16 %v1105_v54, %v1101_v53 }
 0x1e3   : > { %v1194_v60 = vpack.c.bf16 %v1106_v57, %v1102_v56  ;;  %v921_v61 = vpop.f32.mrb[8].mxu1  ;;  %1721 = vmatpush1.bf16.msra.mxu0 %v2644_v52  ;;  %v2665_v57 = vld [vmem:[%s3310_s29 + $0x180] ss:$8 sps:$4 sm:$0xff]  }
 0x1e4   : > { %v922_v0 = vadd.f32 %v921_v61, %v3510_v24  ;;  %v923_v1 = vpop.f32.mrb[9].mxu1  ;;  %1722 = vmatprep.subr.bf16.mxu0 %v2649_v55  ;;  %v2670_v61 = vld [vmem:[%s3310_s29 + $0x194] ss:$8 sps:$4 sm:$0xff]  }
 0x1e5   : > { %v924_v3 = vadd.f32 %v923_v1, %v3515_v25  ;;  %v925_v4 = vpop.f32.mrb[10].mxu1  ;;  %1647 = vmatprep.mubr.bf16.mxu0 %v1194_v60 }
 0x1e6   : > { %v926_v5 = vadd.f32 %v925_v4, %v3510_v24  ;;  %v927_v6 = vpop.f32.mrb[11].mxu1  ;;  %1648 = vmatmul.mubr.bf16.gmra.mrb[4].mxu0 %v1193_v58  ;;  %v1109_v9 = vmax.f32 %v922_v0, 0.0  ;;  %v2668_v4 = vld [vmem:[%s3310_s29 + $0x190] ss:$8 sps:$4 sm:$0xff]  }
 0x1e7   : > { %v928_v7 = vadd.f32 %v927_v6, %v3515_v25  ;;  %1723 = vmatpush1.bf16.msra.mxu0 %v2647_v62  ;;  %v1110_v14 = vmax.f32 %v924_v3, 0.0 }
 0x1e8   : > { %v1113_v10 = vmax.f32 %v926_v5, 0.0  ;;  %1724 = vmatprep.subr.bf16.mxu0 %v2652_v2 }
 0x1e9   : > { %v1114_v15 = vmax.f32 %v928_v7, 0.0  ;;  %v2673_v7 = vld [vmem:[%s3310_s29 + $0x1a4] ss:$8 sps:$4 sm:$0xff]  }
 0x1ea   : > { %v1197_v17 = vpack.c.bf16 %v1113_v10, %v1109_v9 }
 0x1eb   : > { %v1198_v18 = vpack.c.bf16 %v1114_v15, %v1110_v14  ;;  %v931_v19 = vpop.f32.mrb[12].mxu1  ;;  %1725 = vmatpush1.bf16.msra.mxu0 %v2650_v8  ;;  %v2671_v15 = vld [vmem:[%s3310_s29 + $0x1a0] ss:$8 sps:$4 sm:$0xff]  }
 0x1ec   : > { %v932_v16 = vadd.f32 %v931_v19, %v3510_v24  ;;  %v933_v21 = vpop.f32.mrb[13].mxu1  ;;  %1726 = vmatprep.subr.bf16.mxu0 %v2655_v12  ;;  %v2676_v19 = vld [vmem:[%s3310_s29 + $0x1b4] ss:$8 sps:$4 sm:$0xff]  }
 0x1ed   : > { %v934_v48 = vadd.f32 %v933_v21, %v3515_v25  ;;  %v935_v59 = vpop.f32.mrb[14].mxu1  ;;  %1657 = vmatprep.mubr.bf16.mxu0 %v1198_v18 }
 0x1ee   : > { %v936_v63 = vadd.f32 %v935_v59, %v3510_v24  ;;  %v937_v26 = vpop.f32.mrb[15].mxu1  ;;  %1658 = vmatmul.mubr.bf16.gmra.mrb[8].mxu0 %v1197_v17  ;;  %v1117_v29 = vmax.f32 %v932_v16, 0.0  ;;  %v2674_v59 = vld [vmem:[%s3310_s29 + $0x1b0] ss:$8 sps:$4 sm:$0xff]  }
 0x1ef   : > { %v938_v27 = vadd.f32 %v937_v26, %v3515_v25  ;;  %1727 = vmatpush1.bf16.msra.mxu0 %v2653_v20  ;;  %v1118_v32 = vmax.f32 %v934_v48, 0.0 }
 0x1f0   : > { %v1121_v30 = vmax.f32 %v936_v63, 0.0  ;;  %1728 = vmatprep.subr.bf16.mxu0 %v2658_v45 }
 0x1f1   : > { %v1122_v33 = vmax.f32 %v938_v27, 0.0  ;;  %v2679_v27 = vld [vmem:[%s3310_s29 + $0x1c4] ss:$8 sps:$4 sm:$0xff]  }
 0x1f2   : > { %v1201_v34 = vpack.c.bf16 %v1121_v30, %v1117_v29 }
 0x1f3   : > { %v1202_v35 = vpack.c.bf16 %v1122_v33, %v1118_v32  ;;  %v941_v36 = vpop.f32.mrb[16].mxu1  ;;  %1729 = vmatpush1.bf16.msra.mxu0 %v2656_v28  ;;  %v2677_v33 = vld [vmem:[%s3310_s29 + $0x1c0] ss:$8 sps:$4 sm:$0xff]  }
 0x1f4   : > { %v942_v38 = vadd.f32 %v941_v36, %v3510_v24  ;;  %v943_v39 = vpop.f32.mrb[17].mxu1  ;;  %1730 = vmatprep.subr.bf16.mxu0 %v2661_v31  ;;  %v2682_v36 = vld [vmem:[%s3310_s29 + $0x1d4] ss:$8 sps:$4 sm:$0xff]  }
 0x1f5   : > { %v944_v41 = vadd.f32 %v943_v39, %v3515_v25  ;;  %v945_v42 = vpop.f32.mrb[18].mxu1  ;;  %1667 = vmatprep.mubr.bf16.mxu0 %v1202_v35 }
 0x1f6   : > { %v946_v43 = vadd.f32 %v945_v42, %v3510_v24  ;;  %v947_v44 = vpop.f32.mrb[19].mxu1  ;;  %1668 = vmatmul.mubr.bf16.gmra.mrb[12].mxu0 %v1201_v34  ;;  %v1125_v49 = vmax.f32 %v942_v38, 0.0 }
 0x1f7   : > { %v948_v46 = vadd.f32 %v947_v44, %v3515_v25  ;;  %1731 = vmatpush1.bf16.msra.mxu0 %v2659_v37  ;;  %v1126_v52 = vmax.f32 %v944_v41, 0.0  ;;  %v537_v37 = vsub.s32 2, %v3500_v11  ;;  %v2680_v44 = vld [vmem:[%s3310_s29 + $0x1d0] ss:$8 sps:$4 sm:$0xff]  }
 0x1f8   : > { %v1129_v50 = vmax.f32 %v946_v43, 0.0  ;;  %1732 = vmatprep.subr.bf16.mxu0 %v2664_v40  ;;  %v541_v40 = vsub.s32 3, %v3500_v11 }
 0x1f9   : > { %v1130_v53 = vmax.f32 %v948_v46, 0.0 }
 0x1fa   : > { %v1205_v54 = vpack.c.bf16 %v1129_v50, %v1125_v49  ;;  %v3579_v49 = vrot.slane %v3504_v22, %v537_v37  ;;  %v2685_v50 = vld [vmem:[%s3310_s29 + $0x1e4] ss:$8 sps:$4 sm:$0xff]  }
 0x1fb   : > { %v1206_v55 = vpack.c.bf16 %v1130_v53, %v1126_v52  ;;  %v951_v56 = vpop.f32.mrb[20].mxu1  ;;  %1733 = vmatpush1.bf16.msra.mxu0 %v2662_v47  ;;  %v3583_v53 = vrot.slane %v3504_v22, %v541_v40 }
 0x1fc   : > { %v952_v58 = vadd.f32 %v951_v56, %v3510_v24  ;;  %v953_v60 = vpop.f32.mrb[21].mxu1  ;;  %1734 = vmatprep.subr.bf16.mxu0 %v2667_v51 }
 0x1fd   : > { %v954_v62 = vadd.f32 %v953_v60, %v3515_v25  ;;  %v955_v0 = vpop.f32.mrb[22].mxu1  ;;  %1677 = vmatprep.mubr.bf16.mxu0 %v1206_v55 }
 0x1fe   : > { %v956_v1 = vadd.f32 %v955_v0, %v3510_v24  ;;  %v957_v2 = vpop.f32.mrb[23].mxu1  ;;  %1678 = vmatmul.mubr.bf16.gmra.mrb[16].mxu0 %v1205_v54  ;;  %v1133_v5 = vmax.f32 %v952_v58, 0.0  ;;  %v2688_v58 = vld [vmem:[%s3310_s29 + $0x1f4] ss:$8 sps:$4 sm:$0xff]  }
 0x1ff   : > { %v958_v3 = vadd.f32 %v957_v2, %v3515_v25  ;;  %1735 = vmatpush1.bf16.msra.mxu0 %v2665_v57  ;;  %v1134_v8 = vmax.f32 %v954_v62, 0.0 }
 0x200   : > { %v1137_v6 = vmax.f32 %v956_v1, 0.0  ;;  %1736 = vmatprep.subr.bf16.mxu0 %v2670_v61  ;;  %v2686_v1 = vld [vmem:[%s3310_s29 + $0x1f0] ss:$8 sps:$4 sm:$0xff]  }
 0x201   : > { %v1138_v9 = vmax.f32 %v958_v3, 0.0 }
 0x202   : > { %v1209_v10 = vpack.c.bf16 %v1137_v6, %v1133_v5 }
 0x203   : > { %v1210_v12 = vpack.c.bf16 %v1138_v9, %v1134_v8  ;;  %v961_v14 = vpop.f32.mrb[24].mxu1  ;;  %1737 = vmatpush1.bf16.msra.mxu0 %v2668_v4 }
 0x204   : > { %v962_v17 = vadd.f32 %v961_v14, %v3510_v24  ;;  %v963_v18 = vpop.f32.mrb[25].mxu1  ;;  %1738 = vmatprep.subr.bf16.mxu0 %v2673_v7 }
 0x205   : > { %v964_v20 = vadd.f32 %v963_v18, %v3515_v25  ;;  %v965_v16 = vpop.f32.mrb[26].mxu1  ;;  %1687 = vmatprep.mubr.bf16.mxu0 %v1210_v12 }
 0x206   : > { %v966_v21 = vadd.f32 %v965_v16, %v3510_v24  ;;  %v967_v45 = vpop.f32.mrb[27].mxu1  ;;  %1688 = vmatmul.mubr.bf16.gmra.mrb[20].mxu0 %v1209_v10  ;;  %v1141_v63 = vmax.f32 %v962_v17, 0.0 }
 0x207   : > { %v968_v48 = vadd.f32 %v967_v45, %v3515_v25  ;;  %1739 = vmatpush1.bf16.msra.mxu0 %v2671_v15  ;;  %v1142_v28 = vmax.f32 %v964_v20, 0.0 }
 0x208   : > { %v1145_v26 = vmax.f32 %v966_v21, 0.0  ;;  %1740 = vmatprep.subr.bf16.mxu0 %v2676_v19 }
 0x209   : > { %v1146_v29 = vmax.f32 %v968_v48, 0.0 }
 0x20a   : > { %v1213_v30 = vpack.c.bf16 %v1145_v26, %v1141_v63 }
 0x20b   : > { %v1214_v31 = vpack.c.bf16 %v1146_v29, %v1142_v28  ;;  %v971_v32 = vpop.f32.mrb[28].mxu1  ;;  %1741 = vmatpush1.bf16.msra.mxu0 %v2674_v59 }
 0x20c   : > { %v972_v34 = vadd.f32 %v971_v32, %v3510_v24  ;;  %v973_v35 = vpop.f32.mrb[29].mxu1  ;;  %1742 = vmatprep.subr.bf16.mxu0 %v2679_v27 }
 0x20d   : > { %v974_v38 = vadd.f32 %v973_v35, %v3515_v25  ;;  %v975_v39 = vpop.f32.mrb[30].mxu1  ;;  %1697 = vmatprep.mubr.bf16.mxu0 %v1214_v31 }
 0x20e   : > { %v976_v41 = vadd.f32 %v975_v39, %v3510_v24  ;;  %v977_v42 = vpop.f32.mrb[31].mxu1  ;;  %1698 = vmatmul.mubr.bf16.gmra.mrb[24].mxu0 %v1213_v30  ;;  %v1149_v46 = vmax.f32 %v972_v34, 0.0 }
 0x20f   : > { %v978_v43 = vadd.f32 %v977_v42, %v3515_v25  ;;  %1743 = vmatpush1.bf16.msra.mxu0 %v2677_v33  ;;  %v1150_v51 = vmax.f32 %v974_v38, 0.0  ;;  %v2683_v25 = vld [vmem:[%s3310_s29 + $0x1e0] ss:$8 sps:$4 sm:$0xff]  }
 0x210   : > { %v1153_v47 = vmax.f32 %v976_v41, 0.0  ;;  %1744 = vmatprep.subr.bf16.mxu0 %v2682_v36 }
 0x211   : > { %v1154_v52 = vmax.f32 %v978_v43, 0.0 }
 0x212   : > { %v1217_v24 = vpack.c.bf16 %v1153_v47, %v1149_v46 }
 0x213   : > { %v1218_v54 = vpack.c.bf16 %v1154_v52, %v1150_v51  ;;  %v1014_v55 = vpop.f32.mrb[32].mxu1  ;;  %1745 = vmatpush1.bf16.msra.mxu0 %v2680_v44 }
 0x214   : > { %v1015_v56 = vadd.f32 %v1014_v55, %v3579_v49  ;;  %v1016_v57 = vpop.f32.mrb[33].mxu1  ;;  %1746 = vmatprep.subr.bf16.mxu0 %v2685_v50 }
 0x215   : > { %v1017_v60 = vadd.f32 %v1016_v57, %v3583_v53  ;;  %v1018_v61 = vpop.f32.mrb[34].mxu1  ;;  %1707 = vmatprep.mubr.bf16.mxu0 %v1218_v54 }
 0x216   : > { %v1019_v62 = vadd.f32 %v1018_v61, %v3579_v49  ;;  %v1020_v0 = vpop.f32.mrb[35].mxu1  ;;  %1708 = vmatmul.mubr.bf16.gmra.mrb[28].mxu0 %v1217_v24  ;;  %v1095_v2 = vmax.f32 %v1015_v56, 0.0 }
 0x217   : > { %v1021_v22 = vadd.f32 %v1020_v0, %v3583_v53  ;;  %1747 = vmatpush1.bf16.msra.mxu0 %v2683_v25  ;;  %v1096_v4 = vmax.f32 %v1017_v60, 0.0 }
 0x218   : > { %v1099_v3 = vmax.f32 %v1019_v62, 0.0  ;;  %1748 = vmatprep.subr.bf16.mxu0 %v2688_v58 }
 0x219   : > { %v1100_v5 = vmax.f32 %v1021_v22, 0.0 }
 0x21a   : > { %v1191_v6 = vpack.c.bf16 %v1099_v3, %v1095_v2 }
 0x21b   : > { %v1192_v7 = vpack.c.bf16 %v1100_v5, %v1096_v4  ;;  %v1024_v8 = vpop.f32.mrb[36].mxu1  ;;  %1749 = vmatpush1.bf16.msra.mxu0 %v2686_v1 }
 0x21c   : > { %v1025_v9 = vadd.f32 %v1024_v8, %v3579_v49  ;;  %v1026_v10 = vpop.f32.mrb[37].mxu1 }
 0x21d   : > { %v1027_v12 = vadd.f32 %v1026_v10, %v3583_v53  ;;  %v1028_v14 = vpop.f32.mrb[38].mxu1  ;;  %1750 = vmatprep.mubr.bf16.mxu0 %v1192_v7 }
 0x21e   : > { %v1029_v15 = vadd.f32 %v1028_v14, %v3579_v49  ;;  %v1030_v17 = vpop.f32.mrb[39].mxu1  ;;  %1751 = vmatmul.mubr.bf16.vlgmr.msra.gmra.mrb[0].mxu0 %v1191_v6  ;;  %v1103_v19 = vmax.f32 %v1025_v9, 0.0 }
 0x21f   : > { %v1031_v18 = vadd.f32 %v1030_v17, %v3583_v53  ;;  %v1104_v16 = vmax.f32 %v1027_v12, 0.0 }
 0x220   : > { %v1107_v20 = vmax.f32 %v1029_v15, 0.0 }
 0x221   : > { %v1108_v21 = vmax.f32 %v1031_v18, 0.0 }
 0x222   : > { %v1195_v45 = vpack.c.bf16 %v1107_v20, %v1103_v19 }
 0x223   : > { %v1196_v48 = vpack.c.bf16 %v1108_v21, %v1104_v16  ;;  %v1034_v59 = vpop.f32.mrb[40].mxu1 }
 0x224   : > { %v1035_v63 = vadd.f32 %v1034_v59, %v3579_v49  ;;  %v1036_v26 = vpop.f32.mrb[41].mxu1 }
 0x225   : > { %v1037_v27 = vadd.f32 %v1036_v26, %v3583_v53  ;;  %v1038_v28 = vpop.f32.mrb[42].mxu1  ;;  %1760 = vmatprep.mubr.bf16.mxu0 %v1196_v48 }
 0x226   : > { %v1039_v29 = vadd.f32 %v1038_v28, %v3579_v49  ;;  %v1040_v30 = vpop.f32.mrb[43].mxu1  ;;  %1761 = vmatmul.mubr.bf16.gmra.mrb[4].mxu0 %v1195_v45  ;;  %v1111_v32 = vmax.f32 %v1035_v63, 0.0 }
 0x227   : > { %v1041_v31 = vadd.f32 %v1040_v30, %v3583_v53  ;;  %v1112_v34 = vmax.f32 %v1037_v27, 0.0 }
 0x228   : > { %v1115_v33 = vmax.f32 %v1039_v29, 0.0 }
 0x229   : > { %v1116_v35 = vmax.f32 %v1041_v31, 0.0 }
 0x22a   : > { %v1199_v36 = vpack.c.bf16 %v1115_v33, %v1111_v32 }
 0x22b   : > { %v1200_v37 = vpack.c.bf16 %v1116_v35, %v1112_v34  ;;  %v1044_v38 = vpop.f32.mrb[44].mxu1 }
 0x22c   : > { %v1045_v39 = vadd.f32 %v1044_v38, %v3579_v49  ;;  %v1046_v40 = vpop.f32.mrb[45].mxu1 }
 0x22d   : > { %v1047_v41 = vadd.f32 %v1046_v40, %v3583_v53  ;;  %v1048_v42 = vpop.f32.mrb[46].mxu1  ;;  %1770 = vmatprep.mubr.bf16.mxu0 %v1200_v37 }
 0x22e   : > { %v1049_v43 = vadd.f32 %v1048_v42, %v3579_v49  ;;  %v1050_v44 = vpop.f32.mrb[47].mxu1  ;;  %1771 = vmatmul.mubr.bf16.gmra.mrb[8].mxu0 %v1199_v36  ;;  %v1119_v47 = vmax.f32 %v1045_v39, 0.0 }
 0x22f   : > { %v1051_v46 = vadd.f32 %v1050_v44, %v3583_v53  ;;  %v1120_v51 = vmax.f32 %v1047_v41, 0.0 }
 0x230   : > { %v1123_v50 = vmax.f32 %v1049_v43, 0.0 }
 0x231   : > { %v1124_v52 = vmax.f32 %v1051_v46, 0.0 }
 0x232   : > { %v1203_v24 = vpack.c.bf16 %v1123_v50, %v1119_v47 }
 0x233   : > { %v1204_v54 = vpack.c.bf16 %v1124_v52, %v1120_v51  ;;  %v1054_v55 = vpop.f32.mrb[48].mxu1  ;;  %v1157_v52 = vld [vmem:[#allocation2] sm:$0xff] }
 0x234   : > { %v1055_v25 = vadd.f32 %v1054_v55, %v3579_v49  ;;  %v1056_v56 = vpop.f32.mrb[49].mxu1  ;;  %v1159_v55 = vld [vmem:[#allocation2 + $0x10] sm:$0xff] }
 0x235   : > { %v1057_v57 = vadd.f32 %v1056_v56, %v3583_v53  ;;  %v1058_v58 = vpop.f32.mrb[50].mxu1  ;;  %1780 = vmatprep.mubr.bf16.mxu0 %v1204_v54 }
 0x236   : > { %v1059_v60 = vadd.f32 %v1058_v58, %v3579_v49  ;;  %v1060_v61 = vpop.f32.mrb[51].mxu1  ;;  %1781 = vmatmul.mubr.bf16.gmra.mrb[12].mxu0 %v1203_v24  ;;  %v1127_v0 = vmax.f32 %v1055_v25, 0.0  ;;  %v1158_v24 = vld [vmem:[#allocation2 + $0x8] sm:$0xff] }
 0x237   : > { %v1061_v62 = vadd.f32 %v1060_v61, %v3583_v53  ;;  %v1128_v1 = vmax.f32 %v1057_v57, 0.0  ;;  %v1160_v57 = vld [vmem:[#allocation2 + $0x18] sm:$0xff] }
 0x238   : > { %v1131_v22 = vmax.f32 %v1059_v60, 0.0 }
 0x239   : > { %v1132_v2 = vmax.f32 %v1061_v62, 0.0  ;;  %v1161_v62 = vld [vmem:[#allocation2 + $0x20] sm:$0xff] }
 0x23a   : > { %v1207_v3 = vpack.c.bf16 %v1131_v22, %v1127_v0  ;;  %v1162_v0 = vld [vmem:[#allocation2 + $0x28] sm:$0xff] }
 0x23b   : > { %v1208_v4 = vpack.c.bf16 %v1132_v2, %v1128_v1  ;;  %v1064_v5 = vpop.f32.mrb[52].mxu1  ;;  %v1163_v1 = vld [vmem:[#allocation2 + $0x30] sm:$0xff] }
 0x23c   : > { %v1065_v6 = vadd.f32 %v1064_v5, %v3579_v49  ;;  %v1066_v7 = vpop.f32.mrb[53].mxu1 }
 0x23d   : > { %v1067_v8 = vadd.f32 %v1066_v7, %v3583_v53  ;;  %v1068_v9 = vpop.f32.mrb[54].mxu1  ;;  %1790 = vmatprep.mubr.bf16.mxu0 %v1208_v4  ;;  %v1164_v4 = vld [vmem:[#allocation2 + $0x38] sm:$0xff] }
 0x23e   : > { %v1069_v10 = vadd.f32 %v1068_v9, %v3579_v49  ;;  %v1070_v12 = vpop.f32.mrb[55].mxu1  ;;  %1791 = vmatmul.mubr.bf16.gmra.mrb[16].mxu0 %v1207_v3  ;;  %v1135_v15 = vmax.f32 %v1065_v6, 0.0 }
 0x23f   : > { %v1071_v14 = vadd.f32 %v1070_v12, %v3583_v53  ;;  %v1136_v18 = vmax.f32 %v1067_v8, 0.0  ;;  %v1166_v12 = vld [vmem:[#allocation2 + $0x48] sm:$0xff] }
 0x240   : > { %v1139_v17 = vmax.f32 %v1069_v10, 0.0  ;;  %v1165_v10 = vld [vmem:[#allocation2 + $0x40] sm:$0xff] }
 0x241   : > { %v1140_v19 = vmax.f32 %v1071_v14, 0.0 }
 0x242   : > { %v1211_v20 = vpack.c.bf16 %v1139_v17, %v1135_v15  ;;  %v1167_v15 = vld [vmem:[#allocation2 + $0x50] sm:$0xff] }
 0x243   : > { %v1212_v16 = vpack.c.bf16 %v1140_v19, %v1136_v18  ;;  %v1074_v21 = vpop.f32.mrb[56].mxu1  ;;  %v1168_v19 = vld [vmem:[#allocation2 + $0x58] sm:$0xff] }
 0x244   : > { %v1075_v45 = vadd.f32 %v1074_v21, %v3579_v49  ;;  %v1076_v48 = vpop.f32.mrb[57].mxu1 }
 0x245   : > { %v1077_v59 = vadd.f32 %v1076_v48, %v3583_v53  ;;  %v1078_v63 = vpop.f32.mrb[58].mxu1  ;;  %1800 = vmatprep.mubr.bf16.mxu0 %v1212_v16 }
 0x246   : > { %v1079_v26 = vadd.f32 %v1078_v63, %v3579_v49  ;;  %v1080_v27 = vpop.f32.mrb[59].mxu1  ;;  %1801 = vmatmul.mubr.bf16.gmra.mrb[20].mxu0 %v1211_v20  ;;  %v1143_v29 = vmax.f32 %v1075_v45, 0.0  ;;  %v1170_v63 = vld [vmem:[#allocation2 + $0x68] sm:$0xff] }
 0x247   : > { %v1081_v28 = vadd.f32 %v1080_v27, %v3583_v53  ;;  %v1144_v31 = vmax.f32 %v1077_v59, 0.0  ;;  %v1169_v59 = vld [vmem:[#allocation2 + $0x60] sm:$0xff]  ;;  %v1171_v27 = vld [vmem:[#allocation2 + $0x70] sm:$0xff] }
 0x248   : > { %v1147_v30 = vmax.f32 %v1079_v26, 0.0 }
 0x249   : > { %v1148_v32 = vmax.f32 %v1081_v28, 0.0 }
 0x24a   : > { %v1215_v33 = vpack.c.bf16 %v1147_v30, %v1143_v29  ;;  %v1172_v30 = vld [vmem:[#allocation2 + $0x78] sm:$0xff] }
 0x24b   : > { %v1216_v34 = vpack.c.bf16 %v1148_v32, %v1144_v31  ;;  %v1084_v35 = vpop.f32.mrb[60].mxu1 }
 0x24c   : > { %v1085_v36 = vadd.f32 %v1084_v35, %v3579_v49  ;;  %v1086_v37 = vpop.f32.mrb[61].mxu1 }
 0x24d   : > { %v1087_v38 = vadd.f32 %v1086_v37, %v3583_v53  ;;  %v1088_v39 = vpop.f32.mrb[62].mxu1  ;;  %1810 = vmatprep.mubr.bf16.mxu0 %v1216_v34  ;;  %v1174_v37 = vld [vmem:[#allocation2 + $0x88] sm:$0xff] }
 0x24e   : > { %v1089_v40 = vadd.f32 %v1088_v39, %v3579_v49  ;;  %v1090_v41 = vpop.f32.mrb[63].mxu1  ;;  %1811 = vmatmul.mubr.bf16.gmra.mrb[24].mxu0 %v1215_v33  ;;  %v1151_v43 = vmax.f32 %v1085_v36, 0.0  ;;  %v1173_v36 = vld [vmem:[#allocation2 + $0x80] sm:$0xff]  ;;  %v1175_v39 = vld [vmem:[#allocation2 + $0x90] sm:$0xff] }
 0x24f   : > { %v1091_v42 = vadd.f32 %v1090_v41, %v3583_v53  ;;  %v1152_v46 = vmax.f32 %v1087_v38, 0.0 }
 0x250   : > { %v1155_v44 = vmax.f32 %v1089_v40, 0.0 }
 0x251   : > { %v1156_v47 = vmax.f32 %v1091_v42, 0.0  ;;  %v1176_v42 = vld [vmem:[#allocation2 + $0x98] sm:$0xff] }
 0x252   : > { %v1219_v50 = vpack.c.bf16 %v1155_v44, %v1151_v43 }
 0x253   : > { %v1220_v51 = vpack.c.bf16 %v1156_v47, %v1152_v46 }
 0x255   : > { %1820 = vmatprep.mubr.bf16.mxu0 %v1220_v51  ;;  %v1177_v51 = vld [vmem:[#allocation2 + $0xa0] sm:$0xff] }
 0x256   : > { %1821 = vmatmul.mubr.bf16.gmra.mrb[28].mxu0 %v1219_v50 }
 0x2f1   : > { %v1752_v54 = vpop.f32.mrb[0].mxu0 }
 0x2f2   : > { %v1831_v25 = vadd.f32 %v1752_v54, %v1157_v52  ;;  %v1754_v56 = vpop.f32.mrb[1].mxu0  ;;  %v1178_v52 = vld [vmem:[#allocation2 + $0xa8] sm:$0xff]  ;;  %v1179_v54 = vld [vmem:[#allocation2 + $0xb0] sm:$0xff] }
 0x2f3   : > { %v1832_v49 = vadd.f32 %v1754_v56, %v1158_v24  ;;  %v1756_v58 = vpop.f32.mrb[2].mxu0  ;;  %v1180_v56 = vld [vmem:[#allocation2 + $0xb8] sm:$0xff] }
 0x2f4   : > { %1863 = vst [vmem:[#allocation2] sm:$0xff] %v1831_v25  ;;  %v1833_v60 = vadd.f32 %v1756_v58, %v1159_v55  ;;  %v1758_v53 = vpop.f32.mrb[3].mxu0 }
 0x2f5   : > { %1864 = vst [vmem:[#allocation2 + $0x8] sm:$0xff] %v1832_v49  ;;  %v1834_v61 = vadd.f32 %v1758_v53, %v1160_v57 }
 0x2f6   : > { %1865 = vst [vmem:[#allocation2 + $0x10] sm:$0xff] %v1833_v60 }
 0x2f7   : > { %1866 = vst [vmem:[#allocation2 + $0x18] sm:$0xff] %v1834_v61  ;;  %v1181_v61 = vld [vmem:[#allocation2 + $0xc0] sm:$0xff] }
 0x2f9   : > { %v1762_v22 = vpop.f32.mrb[4].mxu0 }
 0x2fa   : > { %v1835_v2 = vadd.f32 %v1762_v22, %v1161_v62  ;;  %v1764_v3 = vpop.f32.mrb[5].mxu0  ;;  %v1182_v62 = vld [vmem:[#allocation2 + $0xc8] sm:$0xff]  ;;  %v1183_v22 = vld [vmem:[#allocation2 + $0xd0] sm:$0xff] }
 0x2fb   : > { %v1836_v5 = vadd.f32 %v1764_v3, %v1162_v0  ;;  %v1766_v6 = vpop.f32.mrb[6].mxu0  ;;  %v1184_v3 = vld [vmem:[#allocation2 + $0xd8] sm:$0xff] }
 0x2fc   : > { %1867 = vst [vmem:[#allocation2 + $0x20] sm:$0xff] %v1835_v2  ;;  %v1837_v7 = vadd.f32 %v1766_v6, %v1163_v1  ;;  %v1768_v8 = vpop.f32.mrb[7].mxu0 }
 0x2fd   : > { %1868 = vst [vmem:[#allocation2 + $0x28] sm:$0xff] %v1836_v5  ;;  %v1838_v9 = vadd.f32 %v1768_v8, %v1164_v4 }
 0x2fe   : > { %1869 = vst [vmem:[#allocation2 + $0x30] sm:$0xff] %v1837_v7 }
 0x2ff   : > { %1870 = vst [vmem:[#allocation2 + $0x38] sm:$0xff] %v1838_v9  ;;  %v1185_v9 = vld [vmem:[#allocation2 + $0xe0] sm:$0xff] }
 0x301   : > { %v1772_v14 = vpop.f32.mrb[8].mxu0 }
 0x302   : > { %v1839_v17 = vadd.f32 %v1772_v14, %v1165_v10  ;;  %v1774_v18 = vpop.f32.mrb[9].mxu0  ;;  %v1186_v10 = vld [vmem:[#allocation2 + $0xe8] sm:$0xff]  ;;  %v1187_v14 = vld [vmem:[#allocation2 + $0xf0] sm:$0xff] }
 0x303   : > { %v1840_v20 = vadd.f32 %v1774_v18, %v1166_v12  ;;  %v1776_v16 = vpop.f32.mrb[10].mxu0  ;;  %v1188_v18 = vld [vmem:[#allocation2 + $0xf8] sm:$0xff] }
 0x304   : > { %1871 = vst [vmem:[#allocation2 + $0x40] sm:$0xff] %v1839_v17  ;;  %v1841_v21 = vadd.f32 %v1776_v16, %v1167_v15  ;;  %v1778_v45 = vpop.f32.mrb[11].mxu0 }
 0x305   : > { %1872 = vst [vmem:[#allocation2 + $0x48] sm:$0xff] %v1840_v20  ;;  %v1842_v48 = vadd.f32 %v1778_v45, %v1168_v19 }
 0x306   : > { %1873 = vst [vmem:[#allocation2 + $0x50] sm:$0xff] %v1841_v21 }
 0x307   : > { %1874 = vst [vmem:[#allocation2 + $0x58] sm:$0xff] %v1842_v48  ;;  %v1899_v48 = vld [vmem:[#allocation2] sm:$0xff] (!%p2325_p4) }
 0x309   : > { %v1782_v26 = vpop.f32.mrb[12].mxu0 }
 0x30a   : > { %v1843_v28 = vadd.f32 %v1782_v26, %v1169_v59  ;;  %v1784_v29 = vpop.f32.mrb[13].mxu0  ;;  %v1931_v59 = vld [vmem:[%s3825_s23] sm:$0x3] (!%p2325_p4) }
 0x30b   : > { %v1844_v31 = vadd.f32 %v1784_v29, %v1170_v63  ;;  %v1786_v32 = vpop.f32.mrb[14].mxu0  ;;  %v1900_v63 = vld [vmem:[#allocation2 + $0x8] sm:$0xff] (!%p2325_p4)  ;;  %v3626_v26 = vrot.slane (!%p2325_p4), %v1931_v59, %v529_v13  ;;  %v1902_v29 = vld [vmem:[#allocation2 + $0x18] sm:$0xff] (!%p2325_p4) }
 0x30c   : > { %1875 = vst [vmem:[#allocation2 + $0x60] sm:$0xff] %v1843_v28  ;;  %v1845_v33 = vadd.f32 %v1786_v32, %v1171_v27  ;;  %v1788_v34 = vpop.f32.mrb[15].mxu0  ;;  %v3630_v27 = vrot.slane (!%p2325_p4), %v1931_v59, %v533_v23  ;;  %v1901_v28 = vld [vmem:[#allocation2 + $0x10] sm:$0xff] (!%p2325_p4)  ;;  %v1907_v23 = vld [vmem:[#allocation2 + $0x40] sm:$0xff] (!%p2325_p4) }
 0x30d   : > { %1876 = vst [vmem:[#allocation2 + $0x68] sm:$0xff] %v1844_v31  ;;  %v1846_v35 = vadd.f32 %v1788_v34, %v1172_v30  ;;  %v1903_v30 = vld [vmem:[#allocation2 + $0x20] sm:$0xff] (!%p2325_p4)  ;;  %v1904_v31 = vld [vmem:[#allocation2 + $0x28] sm:$0xff] (!%p2325_p4)  ;;  %v1905_v32 = vld [vmem:[#allocation2 + $0x30] sm:$0xff] (!%p2325_p4)  ;;  %v1943_v34 = vadd.f32 (!%p2325_p4), %v3626_v26, %v1899_v48  ;;  %v1945_v13 = vadd.f32 (!%p2325_p4), %v3626_v26, %v1901_v28 }
 0x30e   : > { %1877 = vst [vmem:[#allocation2 + $0x70] sm:$0xff] %v1845_v33  ;;  %v1906_v33 = vld [vmem:[#allocation2 + $0x38] sm:$0xff] (!%p2325_p4)  ;;  %v1946_v11 = vadd.f32 (!%p2325_p4), %v3630_v27, %v1902_v29 }
 0x30f   : > { %1878 = vst [vmem:[#allocation2 + $0x78] sm:$0xff] %v1846_v35  ;;  %v1944_v35 = vadd.f32 (!%p2325_p4), %v3630_v27, %v1900_v63  ;;  %1975 = vst [vmem:[%s3316_s8] sm:$0xff] (!%p2325_p4), %v1943_v34 }
 0x310   : > { %1977 = vst [vmem:[%s3316_s8 + $0x10] sm:$0xff] (!%p2325_p4), %v1945_v13  ;;  %1978 = vst [vmem:[%s3316_s8 + $0x18] sm:$0xff] (!%p2325_p4), %v1946_v11 }
 0x311   : > { %v1792_v38 = vpop.f32.mrb[16].mxu0  ;;  %1976 = vst [vmem:[%s3316_s8 + $0x8] sm:$0xff] (!%p2325_p4), %v1944_v35 }
 0x312   : > { %v1847_v40 = vadd.f32 %v1792_v38, %v1173_v36  ;;  %v1794_v41 = vpop.f32.mrb[17].mxu0  ;;  %v1908_v36 = vld [vmem:[#allocation2 + $0x48] sm:$0xff] (!%p2325_p4)  ;;  %v1947_v38 = vadd.f32 (!%p2325_p4), %v3626_v26, %v1903_v30 }
 0x313   : > { %v1848_v43 = vadd.f32 %v1794_v41, %v1174_v37  ;;  %v1796_v44 = vpop.f32.mrb[18].mxu0  ;;  %v1909_v37 = vld [vmem:[#allocation2 + $0x50] sm:$0xff] (!%p2325_p4)  ;;  %v1950_v41 = vadd.f32 (!%p2325_p4), %v3630_v27, %v1906_v33 }
 0x314   : > { %1879 = vst [vmem:[#allocation2 + $0x80] sm:$0xff] %v1847_v40  ;;  %v1849_v46 = vadd.f32 %v1796_v44, %v1175_v39  ;;  %v1798_v47 = vpop.f32.mrb[19].mxu0  ;;  %v1948_v39 = vadd.f32 (!%p2325_p4), %v3630_v27, %v1904_v31  ;;  %v1949_v40 = vadd.f32 (!%p2325_p4), %v3626_v26, %v1905_v32  ;;  %v1912_v44 = vld [vmem:[#allocation2 + $0x68] sm:$0xff] (!%p2325_p4)  ;;  %1979 = vst [vmem:[%s3316_s8 + $0x20] sm:$0xff] (!%p2325_p4), %v1947_v38 }
 0x315   : > { %1880 = vst [vmem:[#allocation2 + $0x88] sm:$0xff] %v1848_v43  ;;  %v1850_v50 = vadd.f32 %v1798_v47, %v1176_v42  ;;  %v1910_v42 = vld [vmem:[#allocation2 + $0x58] sm:$0xff] (!%p2325_p4)  ;;  %v1911_v43 = vld [vmem:[#allocation2 + $0x60] sm:$0xff] (!%p2325_p4)  ;;  %v1952_v47 = vadd.f32 (!%p2325_p4), %v3630_v27, %v1908_v36  ;;  %1982 = vst [vmem:[%s3316_s8 + $0x38] sm:$0xff] (!%p2325_p4), %v1950_v41 }
 0x316   : > { %1881 = vst [vmem:[#allocation2 + $0x90] sm:$0xff] %v1849_v46  ;;  %v1951_v46 = vadd.f32 (!%p2325_p4), %v3626_v26, %v1907_v23  ;;  %1980 = vst [vmem:[%s3316_s8 + $0x28] sm:$0xff] (!%p2325_p4), %v1948_v39 }
 0x317   : > { %1882 = vst [vmem:[#allocation2 + $0x98] sm:$0xff] %v1850_v50  ;;  %v1953_v50 = vadd.f32 (!%p2325_p4), %v3626_v26, %v1909_v37  ;;  %1981 = vst [vmem:[%s3316_s8 + $0x30] sm:$0xff] (!%p2325_p4), %v1949_v40 }
 0x318   : > { %1983 = vst [vmem:[%s3316_s8 + $0x40] sm:$0xff] (!%p2325_p4), %v1951_v46  ;;  %1984 = vst [vmem:[%s3316_s8 + $0x48] sm:$0xff] (!%p2325_p4), %v1952_v47 }
 0x319   : > { %v1802_v24 = vpop.f32.mrb[20].mxu0  ;;  %1985 = vst [vmem:[%s3316_s8 + $0x50] sm:$0xff] (!%p2325_p4), %v1953_v50 }
 0x31a   : > { %v1851_v55 = vadd.f32 %v1802_v24, %v1177_v51  ;;  %v1804_v25 = vpop.f32.mrb[21].mxu0  ;;  %v1954_v51 = vadd.f32 (!%p2325_p4), %v3630_v27, %v1910_v42  ;;  %v1914_v24 = vld [vmem:[#allocation2 + $0x78] sm:$0xff] (!%p2325_p4) }
 0x31b   : > { %v1852_v57 = vadd.f32 %v1804_v25, %v1178_v52  ;;  %v1806_v49 = vpop.f32.mrb[22].mxu0  ;;  %v1913_v52 = vld [vmem:[#allocation2 + $0x70] sm:$0xff] (!%p2325_p4)  ;;  %v1956_v25 = vadd.f32 (!%p2325_p4), %v3630_v27, %v1912_v44 }
 0x31c   : > { %1883 = vst [vmem:[#allocation2 + $0xa0] sm:$0xff] %v1851_v55  ;;  %v1853_v58 = vadd.f32 %v1806_v49, %v1179_v54  ;;  %v1808_v60 = vpop.f32.mrb[23].mxu0  ;;  %v1915_v54 = vld [vmem:[#allocation2 + $0x80] sm:$0xff] (!%p2325_p4)  ;;  %v1955_v55 = vadd.f32 (!%p2325_p4), %v3626_v26, %v1911_v43  ;;  %v1916_v49 = vld [vmem:[#allocation2 + $0x88] sm:$0xff] (!%p2325_p4)  ;;  %1986 = vst [vmem:[%s3316_s8 + $0x58] sm:$0xff] (!%p2325_p4), %v1954_v51 }
 0x31d   : > { %1884 = vst [vmem:[#allocation2 + $0xa8] sm:$0xff] %v1852_v57  ;;  %v1854_v53 = vadd.f32 %v1808_v60, %v1180_v56  ;;  %v1957_v56 = vadd.f32 (!%p2325_p4), %v3626_v26, %v1913_v52  ;;  %v1958_v57 = vadd.f32 (!%p2325_p4), %v3630_v27, %v1914_v24  ;;  %1988 = vst [vmem:[%s3316_s8 + $0x68] sm:$0xff] (!%p2325_p4), %v1956_v25 }
 0x31e   : > { %1885 = vst [vmem:[#allocation2 + $0xb0] sm:$0xff] %v1853_v58  ;;  %v1917_v58 = vld [vmem:[#allocation2 + $0x90] sm:$0xff] (!%p2325_p4)  ;;  %v1918_v60 = vld [vmem:[#allocation2 + $0x98] sm:$0xff] (!%p2325_p4)  ;;  %1987 = vst [vmem:[%s3316_s8 + $0x60] sm:$0xff] (!%p2325_p4), %v1955_v55 }
 0x31f   : > { %1886 = vst [vmem:[#allocation2 + $0xb8] sm:$0xff] %v1854_v53  ;;  %v1959_v53 = vadd.f32 (!%p2325_p4), %v3626_v26, %v1915_v54  ;;  %1989 = vst [vmem:[%s3316_s8 + $0x70] sm:$0xff] (!%p2325_p4), %v1957_v56 }
 0x320   : > { %1990 = vst [vmem:[%s3316_s8 + $0x78] sm:$0xff] (!%p2325_p4), %v1958_v57 }
 0x321   : > { %v1812_v0 = vpop.f32.mrb[24].mxu0  ;;  %1991 = vst [vmem:[%s3316_s8 + $0x80] sm:$0xff] (!%p2325_p4), %v1959_v53 }
 0x322   : > { %v1855_v1 = vadd.f32 %v1812_v0, %v1181_v61  ;;  %v1814_v2 = vpop.f32.mrb[25].mxu0  ;;  %v1960_v61 = vadd.f32 (!%p2325_p4), %v3630_v27, %v1916_v49  ;;  %v1962_v0 = vadd.f32 (!%p2325_p4), %v3630_v27, %v1918_v60 }
 0x323   : > { %v1856_v4 = vadd.f32 %v1814_v2, %v1182_v62  ;;  %v1816_v5 = vpop.f32.mrb[26].mxu0  ;;  %v1961_v62 = vadd.f32 (!%p2325_p4), %v3626_v26, %v1917_v58 }
 0x324   : > { %1887 = vst [vmem:[#allocation2 + $0xc0] sm:$0xff] %v1855_v1  ;;  %v1857_v6 = vadd.f32 %v1816_v5, %v1183_v22  ;;  %v1818_v7 = vpop.f32.mrb[27].mxu0  ;;  %v1919_v22 = vld [vmem:[#allocation2 + $0xa0] sm:$0xff] (!%p2325_p4)  ;;  %v1920_v1 = vld [vmem:[#allocation2 + $0xa8] sm:$0xff] (!%p2325_p4)  ;;  %1992 = vst [vmem:[%s3316_s8 + $0x88] sm:$0xff] (!%p2325_p4), %v1960_v61 }
 0x325   : > { %1888 = vst [vmem:[#allocation2 + $0xc8] sm:$0xff] %v1856_v4  ;;  %v1858_v8 = vadd.f32 %v1818_v7, %v1184_v3  ;;  %v1921_v2 = vld [vmem:[#allocation2 + $0xb0] sm:$0xff] (!%p2325_p4)  ;;  %v1963_v3 = vadd.f32 (!%p2325_p4), %v3626_v26, %v1919_v22  ;;  %v1964_v4 = vadd.f32 (!%p2325_p4), %v3630_v27, %v1920_v1  ;;  %1993 = vst [vmem:[%s3316_s8 + $0x90] sm:$0xff] (!%p2325_p4), %v1961_v62 }
 0x326   : > { %1889 = vst [vmem:[#allocation2 + $0xd0] sm:$0xff] %v1857_v6  ;;  %v1965_v5 = vadd.f32 (!%p2325_p4), %v3626_v26, %v1921_v2  ;;  %v1922_v6 = vld [vmem:[#allocation2 + $0xb8] sm:$0xff] (!%p2325_p4)  ;;  %1994 = vst [vmem:[%s3316_s8 + $0x98] sm:$0xff] (!%p2325_p4), %v1962_v0 }
 0x327   : > { %1890 = vst [vmem:[#allocation2 + $0xd8] sm:$0xff] %v1858_v8  ;;  %1995 = vst [vmem:[%s3316_s8 + $0xa0] sm:$0xff] (!%p2325_p4), %v1963_v3 }
 0x328   : > { %1996 = vst [vmem:[%s3316_s8 + $0xa8] sm:$0xff] (!%p2325_p4), %v1964_v4  ;;  %1997 = vst [vmem:[%s3316_s8 + $0xb0] sm:$0xff] (!%p2325_p4), %v1965_v5 }
 0x329   : > { %v1822_v12 = vpop.f32.mrb[28].mxu0  ;;  %1898 = sbr.rel (%p2325_p4) target bundleno = 826 (0x33a), region = 64 }
 0x32a   : > { %v1859_v15 = vadd.f32 %v1822_v12, %v1185_v9  ;;  %v1824_v17 = vpop.f32.mrb[29].mxu0  ;;  %v1966_v9 = vadd.f32 (!%p2325_p4), %v3630_v27, %v1922_v6 }
 0x32b   : > { %v1860_v19 = vadd.f32 %v1824_v17, %v1186_v10  ;;  %v1826_v20 = vpop.f32.mrb[30].mxu0  ;;  %v1923_v7 = vld [vmem:[#allocation2 + $0xc0] sm:$0xff] (!%p2325_p4) }
 0x32c   : > { %1891 = vst [vmem:[#allocation2 + $0xe0] sm:$0xff] %v1859_v15  ;;  %v1861_v16 = vadd.f32 %v1826_v20, %v1187_v14  ;;  %v1828_v21 = vpop.f32.mrb[31].mxu0  ;;  %v1924_v8 = vld [vmem:[#allocation2 + $0xc8] sm:$0xff] (!%p2325_p4)  ;;  %v1967_v10 = vadd.f32 (!%p2325_p4), %v3626_v26, %v1923_v7  ;;  %1998 = vst [vmem:[%s3316_s8 + $0xb8] sm:$0xff] (!%p2325_p4), %v1966_v9 }
 0x32d   : > { %1892 = vst [vmem:[#allocation2 + $0xe8] sm:$0xff] %v1860_v19  ;;  %v1862_v45 = vadd.f32 %v1828_v21, %v1188_v18  ;;  %v1968_v12 = vadd.f32 (!%p2325_p4), %v3630_v27, %v1924_v8  ;;  %v1925_v14 = vld [vmem:[#allocation2 + $0xd0] sm:$0xff] (!%p2325_p4) }
 0x32e   : > { %1893 = vst [vmem:[#allocation2 + $0xf0] sm:$0xff] %v1861_v16  ;;  %v1926_v15 = vld [vmem:[#allocation2 + $0xd8] sm:$0xff] (!%p2325_p4)  ;;  %v1969_v18 = vadd.f32 (!%p2325_p4), %v3626_v26, %v1925_v14  ;;  %1999 = vst [vmem:[%s3316_s8 + $0xc0] sm:$0xff] (!%p2325_p4), %v1967_v10 }
 0x32f   : > { %1894 = vst [vmem:[#allocation2 + $0xf8] sm:$0xff] %v1862_v45  ;;  %v1970_v19 = vadd.f32 (!%p2325_p4), %v3630_v27, %v1926_v15  ;;  %2000 = vst [vmem:[%s3316_s8 + $0xc8] sm:$0xff] (!%p2325_p4), %v1968_v12 }
 0x330   : > { %2001 = vst [vmem:[%s3316_s8 + $0xd0] sm:$0xff] %v1969_v18 }
 0x331   : > { %2002 = vst [vmem:[%s3316_s8 + $0xd8] sm:$0xff] %v1970_v19 }
 0x333   : > { %v1927_v17 = vld [vmem:[#allocation2 + $0xe0] sm:$0xff] }
 0x334   : > { %v1971_v20 = vadd.f32 %v3626_v26, %v1927_v17  ;;  %v1928_v16 = vld [vmem:[#allocation2 + $0xe8] sm:$0xff] }
 0x335   : > { %v1929_v21 = vld [vmem:[#allocation2 + $0xf0] sm:$0xff]  ;;  %v1972_v48 = vadd.f32 %v3630_v27, %v1928_v16 }
 0x336   : > { %v1930_v45 = vld [vmem:[#allocation2 + $0xf8] sm:$0xff]  ;;  %v1973_v59 = vadd.f32 %v3626_v26, %v1929_v21  ;;  %2003 = vst [vmem:[%s3316_s8 + $0xe0] sm:$0xff] %v1971_v20 }
 0x337   : > { %v1974_v63 = vadd.f32 %v3630_v27, %v1930_v45  ;;  %2004 = vst [vmem:[%s3316_s8 + $0xe8] sm:$0xff] %v1972_v48 }
 0x338   : > { %2005 = vst [vmem:[%s3316_s8 + $0xf0] sm:$0xff] %v1973_v59 }
 0x339   : > { %2006 = vst [vmem:[%s3316_s8 + $0xf8] sm:$0xff] %v1974_v63 }
 0x33a PF: > { %s3826_s24 = sld [smem:[#allocation18_spill]]  ;;  %s2022_s13 = sshll.u32 %s3316_s8, 4  ;;  %s3703_s13 = int_to_ptr.vmem [resolvable:$true] %s2022_s13 }
 0x33b   : > { %s3827_s20 = sld [smem:[#allocation27_spill]]  ;;  %s2008_s6 = scalar_lea.sflag [#allocation5], %s3290_s17 }
 0x33c   : > { %s2809_s14 = scalar_lea.vmem %s3703_s13, 4096  ;;  %p3829_p11 = scmp.ne.s32.totalorder %s3812_s12, 0 }
 0x33d   : > { %p2810_p12 = scmp.ne.s32.totalorder %s3703_s13, %s2809_s14  ;;  %s2951_s30 = smov [#allocation11]  }
 0x33e   : > { %s2813_s11 = sshll.u32 %s2951_s30, 4  ;;  %s2814_s11 = int_to_ptr.vmem [resolvable:$false] %s2813_s11 }
 0x33f   : > { %p2811_p5 = pnand %p2810_p12, %p3829_p11  ;;  %s2815_s4 = scalar_lea.vmem %s2814_s11, 8192 }
 0x340   : > { %s2339_s5 = sshll.u32 %s3826_s24, 12  ;;  %p2816_p9 = scmp.lt.s32.totalorder %s3703_s13, %s2814_s11 }
 0x341   : > { %s3828_s15 = smov %s3827_s20  ;;  %s3700_s16 = scalar_lea.hbm %s3827_s20, %s2339_s5 }
 0x342   : > { %p2812_p3 = pneg %p2811_p5  ;;  %p2817_p2 = scmp.lt.s32.totalorder %s2815_s4, %s2809_s14 }
 0x344   : > { %p2818_p0 = por %p2817_p2, %p2816_p9 }
 0x346   : > { %p2819_p10 = pnand %p2818_p0, %p2812_p3 }
 0x348   : > { %2822 = shalt.err (!%p2819_p10)
}
 0x349   : > { %s2823_s27 = scalar_lea.hbm %s3700_s16, 4096  ;;  %s2827_s29 = scalar_lea.hbm %s3828_s15, 16384 }
 0x34a   : > { %p2824_p7 = scmp.ne.s32.totalorder %s3700_s16, %s2823_s27  ;;  %p2828_p13 = scmp.lt.u32.totalorder %s3700_s16, %s3828_s15 }
 0x34b   : > { %p2829_p6 = scmp.lt.u32.totalorder %s2827_s29, %s2823_s27  ;;  %p2831_p12 = scmp.lt.u32.totalorder %s2823_s27, %s3700_s16 }
 0x34c   : > { %p2825_p8 = pnand %p2824_p7, %p3829_p11 }
 0x34d   : > { %p2830_p4 = por %p2829_p6, %p2828_p13 }
 0x34e   : > { %p2826_p1 = pneg %p2825_p8 }
 0x34f   : > { %p2832_p5 = por %p2831_p12, %p2830_p4 }
 0x351   : > { %p2833_p3 = pnand %p2832_p5, %p2826_p1 }
 0x353   : > { %2836 = shalt.err (!%p2833_p3)
}
 0x354   : > { %s2952_s7 = smov 256   ;;  %s2953_s23 = smov 16  }
 0x355   : > { %2380 = dma.vmem_to_hbm [thread:$0]  (%p3829_p11), %s3703_s13, 4096, %s3700_s16, %s2008_s6, %s2952_s7, %s2952_s7, %s2953_s23  }
 0x356 PF: > { %s3830_s24 = sld [smem:[#allocation24_spill]]  ;;  %p2400_p9 = scmp.ge.s32.totalorder %s2939_s28, 2 }
 0x357   : > { %s2037_s5 = sand.u32 1, %s2911_s21  }
 0x358   : > { %s2038_s1 = scalar_lea.sflag [#allocation5], %s2037_s5 }
 0x35c   : > { %p3831_p2 = scmp.ne.s32.totalorder %s3830_s24, 0 }
 0x35e   : > { %p2396_p0 = pnand %p2400_p9, %p3831_p2 }
 0x360   : > { %2894 = dma.done.wait (!%p2396_p0), %s2038_s1, 4096  }
 0x361   : > { %2896 = vsyncadd (!%p2396_p0), %s2038_s1, 4294963200  ;;  %s27_s28 = sadd.s32 1, %s2939_s28   ;;  %s3832_s20 = sld [smem:[#allocation16_spill]] }
 0x362   : > { %p24_p10 = scmp.ge.s32.totalorder %s27_s28, 10   ;;  %s3833_s14 = sld [smem:[#allocation22_spill]] }
 0x363   : > { %s3834_s12 = sld [smem:[#allocation17_spill]]  ;;  %s3835_s23 = sld [smem:[#allocation23_spill]] }
 0x364   : > { %s3836_s25 = sld [smem:[#allocation19_spill]]  ;;  %s3837_s17 = sld [smem:[#allocation20_spill]] }
 0x365   : > { %s3838_s27 = sld [smem:[#allocation21_spill]]  ;;  %s3839_s18 = smov %s2903_s19 }
 0x366   : > { %s3842_s21 = smov %s2915_s22  ;;  %s3844_s24 = smov %s2931_s26 }
 0x367   : > { %s3840_s19 = smov %s3832_s20  ;;  %26 = sbr.rel (!%p24_p10) target bundleno = 17 (0x11), region = 130 }
 0x368   : > { %s3841_s20 = smov %s3833_s14 }
 0x369   : > { %s3843_s22 = smov %s3834_s12 }
 0x36a   : > { %s3845_s26 = smov %s3837_s17 }
 0x36e   :  { %2043 = vsyncpa [#allocation4], 1 }
 0x36f   :  { %2045 = vsyncpa [#allocation4 + $0x1], 1 }
 0x370   :  { %2046 = vsyncpa [#allocation7], 1 }
 0x371   :  { %2048 = vsyncpa [#allocation7 + $0x1], 1 }
 0x372   :  { %2049 = vsyncpa [#allocation10], 1 }
 0x373   :  { %2051 = vsyncpa [#allocation10 + $0x1], 1 }
 0x374   :  { %2052 = vsyncpa [#allocation5], 1 }
 0x375   :  { %2054 = vsyncpa [#allocation5 + $0x1], 1 }

</bundles_post_ra>
